<compile_context>
chip_gen: v7x
topology: tpu7x:2x2x1
jax: 0.10.0
libtpu: 0.0.40
codegen_flags: <defaults>
</compile_context>

<pallas_src>
import functools
import math

import jax
import jax.numpy as jnp
from jax.experimental import pallas as pl
from jax.experimental.pallas import tpu as pltpu

_HIGH = jax.lax.Precision.HIGHEST
# contract the last dim of both operands: q @ k^T without materializing k.T
_TRANS_B = (((1,), (1,)), ((), ()))


def _layernorm(x, w, b, eps=1e-5):
    # fp32 LayerNorm (matches the fp16-safe LayerNorm subclass).
    mu = jnp.mean(x, axis=-1, keepdims=True)
    var = jnp.mean(jnp.square(x - mu), axis=-1, keepdims=True)
    return (x - mu) * jax.lax.rsqrt(var + eps) * w + b


# ------------------------------ fused kernel --------------------------------

def _fused_kernel(num_head, num_token,
                  x_ref, lnpre_w, lnpre_b,
                  ln1_w, ln1_b, w_qkv, b_qkv, w_out, b_out,
                  ln2_w, ln2_b, w_fc, b_fc, w_cproj, b_cproj,
                  lnpost_w, lnpost_b, proj,
                  o_ref,
                  x_sc, attn_sc):
    layer = pl.program_id(1)
    n_layers = pl.num_programs(1)
    Bc, T, D = x_sc.shape
    dh = D // num_head
    scale = 1.0 / math.sqrt(dh)

    # ---- first layer step: load the batch chunk once and apply ln_pre ----
    @pl.when(layer == 0)
    def _():
        x0 = x_ref[...].astype(jnp.float32)
        x_sc[...] = _layernorm(x0, lnpre_w[...], lnpre_b[...])

    x = x_sc[...]                                   # (Bc, T, D) f32 residual stream

    # ---- attention branch: x + out_proj(MHA(ln_1(x))) ----
    h = _layernorm(x, ln1_w[...], ln1_b[...])
    h_rows = h.reshape(Bc * T, D).astype(jnp.bfloat16)          # fold batch into rows
    qkv = jnp.dot(h_rows, w_qkv[...],
                  preferred_element_type=jnp.float32) + b_qkv[...]
    qkv = qkv.reshape(Bc, T, 3 * D)

    for b in range(Bc):                             # static unroll (small Bc)
        q = qkv[b, :, :D]
        k = qkv[b, :, D:2 * D].astype(jnp.bfloat16)
        v = qkv[b, :, 2 * D:].astype(jnp.bfloat16)
        for hd in range(num_head):                  # static unroll over heads
            lo = hd * dh
            qh = (q[:, lo:lo + dh] * scale).astype(jnp.bfloat16)
            kh = k[:, lo:lo + dh]
            vh = v[:, lo:lo + dh]
            s = jax.lax.dot_general(qh, kh, _TRANS_B,
                                    preferred_element_type=jnp.float32)   # (T, T)
            s = s - jnp.max(s, axis=-1, keepdims=True)
            p = jnp.exp(s)
            inv_den = pl.reciprocal(jnp.sum(p, axis=-1, keepdims=True), approx=True)
            ctx = jnp.dot(p.astype(jnp.bfloat16), vh,
                          preferred_element_type=jnp.float32) * inv_den   # (T, dh)
            attn_sc[b, :, lo:lo + dh] = ctx          # scatter head into scratch slab

    attn_rows = attn_sc[...].reshape(Bc * T, D).astype(jnp.bfloat16)
    attn_out = jnp.dot(attn_rows, w_out[...],
                       preferred_element_type=jnp.float32) + b_out[...]
    x = x + attn_out.reshape(Bc, T, D)

    # ---- MLP branch: x + c_proj(QuickGELU(c_fc(ln_2(x)))) ----
    h2 = _layernorm(x, ln2_w[...], ln2_b[...]).reshape(Bc * T, D).astype(jnp.bfloat16)
    m = jnp.dot(h2, w_fc[...], preferred_element_type=jnp.float32) + b_fc[...]
    m = m * jax.nn.sigmoid(1.702 * m)                # QuickGELU
    m = jnp.dot(m.astype(jnp.bfloat16), w_cproj[...],
                preferred_element_type=jnp.float32) + b_cproj[...]
    x = x + m.reshape(Bc, T, D)

    x_sc[...] = x

    # ---- last layer step: ln_post on trailing num_token tokens, then @ proj ----
    @pl.when(layer == n_layers - 1)
    def _():
        # TODO(synk): for context_dim < 128 a lane-dense (B*num_token, C_pad)
        # output slab would avoid masked partial stores; minor here.
        x_tok = x[:, T - num_token:, :]
        h_post = _layernorm(x_tok, lnpost_w[...], lnpost_b[...])
        out = jnp.dot(h_post.reshape(Bc * num_token, D).astype(jnp.bfloat16),
                      proj[...], preferred_element_type=jnp.float32)
        o_ref[...] = out.reshape(Bc, num_token, -1).astype(o_ref.dtype)


# --------------------------------- wrapper -----------------------------------

def _pick_block_b(batch):
    # Fold batch into GEMM rows while keeping >=2 parallel grid steps
    # (v7x has 2 TensorCores).
    bb = max(1, batch // 2)
    while batch % bb:
        bb -= 1
    return bb


def style_adapter_forward(x, params, num_token, num_head, block_b=None):
    B, S, D = x.shape
    lay = params["layers"]
    n_layers = lay["w_qkv"].shape[0]
    C = params["proj"].shape[-1]
    T = S + num_token

    if block_b is None:
        block_b = _pick_block_b(B)
    assert B % block_b == 0
    nb = B // block_b

    style = jnp.broadcast_to(params["style_embedding"], (B, num_token, D))
    x_cat = jnp.concatenate([x, style], axis=1).astype(jnp.float32)   # (B, T, D)

    # Big matmul weights streamed as bf16 (HBM/VMEM traffic halved, MXU-native).
    bf = lambda a: a.astype(jnp.bfloat16)
    w_qkv, w_out = bf(lay["w_qkv"]), bf(lay["w_out"])
    w_fc, w_cproj = bf(lay["w_fc"]), bf(lay["w_cproj"])
    proj = bf(params["proj"])

    def per_layer(shape):   # per-layer stacked param, layer axis squeezed away
        return pl.BlockSpec((None,) + shape, lambda b, l: (l,) + (0,) * len(shape))

    def shared(shape):      # shared param, constant block
        return pl.BlockSpec(shape, lambda b, l: (0,) * len(shape))

    in_specs = [
        pl.BlockSpec((block_b, T, D), lambda b, l: (b, 0, 0)),   # x (fetched once per chunk)
        shared((1, D)), shared((1, D)),                          # ln_pre w, b
        per_layer((1, D)), per_layer((1, D)),                    # ln_1 w, b
        per_layer((D, 3 * D)), per_layer((1, 3 * D)),            # qkv w, b
        per_layer((D, D)), per_layer((1, D)),                    # out_proj w, b
        per_layer((1, D)), per_layer((1, D)),                    # ln_2 w, b
        per_layer((D, 4 * D)), per_layer((1, 4 * D)),            # c_fc w, b
        per_layer((4 * D, D)), per_layer((1, D)),                # c_proj w, b
        shared((1, D)), shared((1, D)),                          # ln_post w, b
        shared((D, C)),                                          # proj
    ]

    return pl.pallas_call(
        functools.partial(_fused_kernel, num_head, num_token),
        out_shape=jax.ShapeDtypeStruct((B, num_token, C), x.dtype),
        grid_spec=pltpu.PrefetchScalarGridSpec(
            num_scalar_prefetch=0,
            grid=(nb, n_layers),
            in_specs=in_specs,
            out_specs=pl.BlockSpec((block_b, num_token, C), lambda b, l: (b, 0, 0)),
            scratch_shapes=[
                pltpu.VMEM((block_b, T, D), jnp.float32),   # residual stream
                pltpu.VMEM((block_b, T, D), jnp.float32),   # per-head attention slab
            ]),
        compiler_params=pltpu.CompilerParams(
            dimension_semantics=("parallel", "arbitrary"),
            vmem_limit_bytes=64 * 1024 * 1024),
    )(x_cat, params["ln_pre_w"], params["ln_pre_b"],
      lay["ln1_w"], lay["ln1_b"], w_qkv, lay["b_qkv"], w_out, lay["b_out"],
      lay["ln2_w"], lay["ln2_b"], w_fc, lay["b_fc"], w_cproj, lay["b_cproj"],
      params["ln_post_w"], params["ln_post_b"], proj)


# ----------------------------- parameter setup -------------------------------

def init_params(key, width, context_dim, num_head, n_layers, num_token):
    D = width
    scale = D ** (-0.5)
    std = 0.02
    ks = jax.random.split(key, 6)

    def nrm(k, shape, s):
        return jax.random.normal(k, shape, jnp.float32) * s

    # NOTE: all linear weights are stored pre-transposed as (in_features,
    # out_features); a PyTorch state_dict would be transposed at load time.
    layers = {
        "ln1_w": jnp.ones((n_layers, 1, D), jnp.float32),
        "ln1_b": jnp.zeros((n_layers, 1, D), jnp.float32),
        "w_qkv": nrm(ks[0], (n_layers, D, 3 * D), std),
        "b_qkv": jnp.zeros((n_layers, 1, 3 * D), jnp.float32),
        "w_out": nrm(ks[1], (n_layers, D, D), std),
        "b_out": jnp.zeros((n_layers, 1, D), jnp.float32),
        "ln2_w": jnp.ones((n_layers, 1, D), jnp.float32),
        "ln2_b": jnp.zeros((n_layers, 1, D), jnp.float32),
        "w_fc": nrm(ks[2], (n_layers, D, 4 * D), std),
        "b_fc": jnp.zeros((n_layers, 1, 4 * D), jnp.float32),
        "w_cproj": nrm(ks[3], (n_layers, 4 * D, D), std),
        "b_cproj": jnp.zeros((n_layers, 1, D), jnp.float32),
    }
    return {
        "style_embedding": nrm(ks[4], (1, num_token, D), scale),
        "ln_pre_w": jnp.ones((1, D), jnp.float32),
        "ln_pre_b": jnp.zeros((1, D), jnp.float32),
        "ln_post_w": jnp.ones((1, D), jnp.float32),
        "ln_post_b": jnp.zeros((1, D), jnp.float32),
        "proj": nrm(ks[5], (D, context_dim), scale),
        "layers": layers,
    }


# ----------------------------- pure-JAX reference ----------------------------

def reference_forward(x, params, num_token, num_head):
    B, S, D = x.shape
    dh = D // num_head
    lay = params["layers"]
    n_layers = lay["w_qkv"].shape[0]

    style = jnp.broadcast_to(params["style_embedding"], (B, num_token, D))
    h = jnp.concatenate([x, style], axis=1)
    h = _layernorm(h, params["ln_pre_w"], params["ln_pre_b"])
    T = h.shape[1]

    for li in range(n_layers):
        hn = _layernorm(h, lay["ln1_w"][li], lay["ln1_b"][li])
        qkv = jnp.einsum("btd,de->bte", hn, lay["w_qkv"][li],
                         precision=_HIGH) + lay["b_qkv"][li]
        q, k, v = qkv[..., :D], qkv[..., D:2 * D], qkv[..., 2 * D:]
        q = q.reshape(B, T, num_head, dh) / math.sqrt(dh)
        k = k.reshape(B, T, num_head, dh)
        v = v.reshape(B, T, num_head, dh)
        s = jnp.einsum("bqhd,bkhd->bhqk", q, k, precision=_HIGH)
        p = jax.nn.softmax(s, axis=-1)
        ctx = jnp.einsum("bhqk,bkhd->bqhd", p, v, precision=_HIGH).reshape(B, T, D)
        attn = jnp.einsum("btd,de->bte", ctx, lay["w_out"][li],
                          precision=_HIGH) + lay["b_out"][li]
        h = h + attn
        hn2 = _layernorm(h, lay["ln2_w"][li], lay["ln2_b"][li])
        m = jnp.einsum("btd,de->bte", hn2, lay["w_fc"][li],
                       precision=_HIGH) + lay["b_fc"][li]
        m = m * jax.nn.sigmoid(1.702 * m)
        m = jnp.einsum("bte,ed->btd", m, lay["w_cproj"][li],
                       precision=_HIGH) + lay["b_cproj"][li]
        h = h + m

    h_tok = h[:, -num_token:, :]
    hp = _layernorm(h_tok, params["ln_post_w"], params["ln_post_b"])
    return jnp.einsum("btd,dc->btc", hp, params["proj"], precision=_HIGH)


# ---------------------------------- main --------------------------------------

if __name__ == "__main__":
    width = 64          # d_model
    context_dim = 32
    num_head = 4
    n_layers = 2
    num_token = 4
    batch = 2
    seq = 8

    key = jax.random.PRNGKey(0)
    k_x, k_p = jax.random.split(key)
    x = jax.random.normal(k_x, (batch, seq, width), jnp.float32)
    params = init_params(k_p, width, context_dim, num_head, n_layers, num_token)

    out = jax.block_until_ready(style_adapter_forward(x, params, num_token, num_head))
    ref = jax.block_until_ready(reference_forward(x, params, num_token, num_head))

    assert out.shape == (batch, num_token, context_dim), out.shape
    # kernel runs the matmuls in bf16 (f32 accumulation); reference is full f32
    err = float(jnp.max(jnp.abs(out - ref)))
    assert err < 3e-2, f"max abs diff vs reference: {err}"
    print("KERNEL_OK")
</pallas_src>

<mosaic_0001>
module attributes {stable_mosaic.version = 11 : i64} {
  func.func @_fused_kernel(%arg0: i32, %arg1: i32, %arg2: memref<1x12x64xf32, #tpu.memory_space<vmem>>, %arg3: memref<1x64xf32, #tpu.memory_space<vmem>>, %arg4: memref<1x64xf32, #tpu.memory_space<vmem>>, %arg5: memref<1x1x64xf32, #tpu.memory_space<vmem>>, %arg6: memref<1x1x64xf32, #tpu.memory_space<vmem>>, %arg7: memref<1x64x192xbf16, #tpu.memory_space<vmem>>, %arg8: memref<1x1x192xf32, #tpu.memory_space<vmem>>, %arg9: memref<1x64x64xbf16, #tpu.memory_space<vmem>>, %arg10: memref<1x1x64xf32, #tpu.memory_space<vmem>>, %arg11: memref<1x1x64xf32, #tpu.memory_space<vmem>>, %arg12: memref<1x1x64xf32, #tpu.memory_space<vmem>>, %arg13: memref<1x64x256xbf16, #tpu.memory_space<vmem>>, %arg14: memref<1x1x256xf32, #tpu.memory_space<vmem>>, %arg15: memref<1x256x64xbf16, #tpu.memory_space<vmem>>, %arg16: memref<1x1x64xf32, #tpu.memory_space<vmem>>, %arg17: memref<1x64xf32, #tpu.memory_space<vmem>>, %arg18: memref<1x64xf32, #tpu.memory_space<vmem>>, %arg19: memref<64x32xbf16, #tpu.memory_space<vmem>>, %arg20: memref<1x4x32xf32, #tpu.memory_space<vmem>>, %arg21: memref<1x12x64xf32, #tpu.memory_space<vmem>>, %arg22: memref<1x12x64xf32, #tpu.memory_space<vmem>>) attributes {dimension_semantics = [#tpu.dimension_semantics<parallel>, #tpu.dimension_semantics<arbitrary>], iteration_bounds = array<i64: 2, 2>, scalar_prefetch = 0 : i64, scratch_operands = 2 : i64, tpu.core_type = #tpu.core_type<tc>, window_params = [{transform_indices = @transform_0, window_bounds = array<i64: 1, 12, 64>}, {pipeline_mode = #tpu.pipeline_mode<synchronous>, transform_indices = @transform_1, window_bounds = array<i64: 1, 64>}, {pipeline_mode = #tpu.pipeline_mode<synchronous>, transform_indices = @transform_2, window_bounds = array<i64: 1, 64>}, {transform_indices = @transform_3, window_bounds = array<i64: 1, 1, 64>}, {transform_indices = @transform_4, window_bounds = array<i64: 1, 1, 64>}, {transform_indices = @transform_5, window_bounds = array<i64: 1, 64, 192>}, {transform_indices = @transform_6, window_bounds = array<i64: 1, 1, 192>}, {transform_indices = @transform_7, window_bounds = array<i64: 1, 64, 64>}, {transform_indices = @transform_8, window_bounds = array<i64: 1, 1, 64>}, {transform_indices = @transform_9, window_bounds = array<i64: 1, 1, 64>}, {transform_indices = @transform_10, window_bounds = array<i64: 1, 1, 64>}, {transform_indices = @transform_11, window_bounds = array<i64: 1, 64, 256>}, {transform_indices = @transform_12, window_bounds = array<i64: 1, 1, 256>}, {transform_indices = @transform_13, window_bounds = array<i64: 1, 256, 64>}, {transform_indices = @transform_14, window_bounds = array<i64: 1, 1, 64>}, {pipeline_mode = #tpu.pipeline_mode<synchronous>, transform_indices = @transform_15, window_bounds = array<i64: 1, 64>}, {pipeline_mode = #tpu.pipeline_mode<synchronous>, transform_indices = @transform_16, window_bounds = array<i64: 1, 64>}, {pipeline_mode = #tpu.pipeline_mode<synchronous>, transform_indices = @transform_17, window_bounds = array<i64: 64, 32>}, {transform_indices = @transform_18, window_bounds = array<i64: 1, 4, 32>}]} {
    %c0_i32 = arith.constant 0 : i32
    %0 = arith.cmpi eq, %arg1, %c0_i32 : i32
    %1 = arith.extui %0 : i1 to i32
    %c0_i32_0 = arith.constant 0 : i32
    %2 = arith.cmpi ne, %1, %c0_i32_0 : i32
    scf.if %2 {
      %c0_90 = arith.constant 0 : index
      %c0_91 = arith.constant 0 : index
      %c0_92 = arith.constant 0 : index
      %209 = vector.load %arg2[%c0_90, %c0_91, %c0_92] : memref<1x12x64xf32, #tpu.memory_space<vmem>>, vector<1x12x64xf32>
      %c0_93 = arith.constant 0 : index
      %c0_94 = arith.constant 0 : index
      %210 = vector.load %arg3[%c0_93, %c0_94] : memref<1x64xf32, #tpu.memory_space<vmem>>, vector<1x64xf32>
      %c0_95 = arith.constant 0 : index
      %c0_96 = arith.constant 0 : index
      %211 = vector.load %arg4[%c0_95, %c0_96] : memref<1x64xf32, #tpu.memory_space<vmem>>, vector<1x64xf32>
      %cst_97 = arith.constant dense<0.000000e+00> : vector<1x12xf32>
      %212 = vector.multi_reduction <add>, %209, %cst_97 [2] : vector<1x12x64xf32> to vector<1x12xf32>
      %213 = vector.shape_cast %212 : vector<1x12xf32> to vector<1x12x1xf32>
      %cst_98 = arith.constant 6.400000e+01 : f32
      %214 = vector.broadcast %cst_98 : f32 to vector<1x12x1xf32>
      %215 = arith.divf %213, %214 : vector<1x12x1xf32>
      %216 = vector.broadcast %215 : vector<1x12x1xf32> to vector<1x12x64xf32>
      %217 = arith.subf %209, %216 : vector<1x12x64xf32>
      %218 = arith.mulf %217, %217 : vector<1x12x64xf32>
      %cst_99 = arith.constant dense<0.000000e+00> : vector<1x12xf32>
      %219 = vector.multi_reduction <add>, %218, %cst_99 [2] : vector<1x12x64xf32> to vector<1x12xf32>
      %220 = vector.shape_cast %219 : vector<1x12xf32> to vector<1x12x1xf32>
      %cst_100 = arith.constant 6.400000e+01 : f32
      %221 = vector.broadcast %cst_100 : f32 to vector<1x12x1xf32>
      %222 = arith.divf %220, %221 : vector<1x12x1xf32>
      %223 = vector.broadcast %215 : vector<1x12x1xf32> to vector<1x12x64xf32>
      %224 = arith.subf %209, %223 : vector<1x12x64xf32>
      %cst_101 = arith.constant 9.99999974E-6 : f32
      %225 = vector.broadcast %cst_101 : f32 to vector<1x12x1xf32>
      %226 = arith.addf %222, %225 : vector<1x12x1xf32>
      %227 = math.rsqrt %226 : vector<1x12x1xf32>
      %228 = vector.broadcast %227 : vector<1x12x1xf32> to vector<1x12x64xf32>
      %229 = arith.mulf %224, %228 : vector<1x12x64xf32>
      %230 = vector.shape_cast %210 : vector<1x64xf32> to vector<1x1x64xf32>
      %231 = vector.broadcast %230 : vector<1x1x64xf32> to vector<1x12x64xf32>
      %232 = arith.mulf %229, %231 : vector<1x12x64xf32>
      %233 = vector.shape_cast %211 : vector<1x64xf32> to vector<1x1x64xf32>
      %234 = vector.broadcast %233 : vector<1x1x64xf32> to vector<1x12x64xf32>
      %235 = arith.addf %232, %234 : vector<1x12x64xf32>
      %c0_102 = arith.constant 0 : index
      %c0_103 = arith.constant 0 : index
      %c0_104 = arith.constant 0 : index
      %236 = vector.load %arg21[%c0_102, %c0_103, %c0_104] : memref<1x12x64xf32, #tpu.memory_space<vmem>>, vector<1x12x64xf32>
      tpu.vector_store %arg21[%c0_102, %c0_103, %c0_104], %235 {strides = array<i32>} : memref<1x12x64xf32, #tpu.memory_space<vmem>>, vector<1x12x64xf32>,
    } else {
    }
    %c0 = arith.constant 0 : index
    %c0_1 = arith.constant 0 : index
    %c0_2 = arith.constant 0 : index
    %3 = vector.load %arg21[%c0, %c0_1, %c0_2] : memref<1x12x64xf32, #tpu.memory_space<vmem>>, vector<1x12x64xf32>
    %c0_3 = arith.constant 0 : index
    %c0_4 = arith.constant 0 : index
    %c0_5 = arith.constant 0 : index
    %4 = vector.load %arg5[%c0_3, %c0_4, %c0_5] : memref<1x1x64xf32, #tpu.memory_space<vmem>>, vector<1x1x64xf32>
    %5 = vector.shape_cast %4 : vector<1x1x64xf32> to vector<1x64xf32>
    %c0_6 = arith.constant 0 : index
    %c0_7 = arith.constant 0 : index
    %c0_8 = arith.constant 0 : index
    %6 = vector.load %arg6[%c0_6, %c0_7, %c0_8] : memref<1x1x64xf32, #tpu.memory_space<vmem>>, vector<1x1x64xf32>
    %7 = vector.shape_cast %6 : vector<1x1x64xf32> to vector<1x64xf32>
    %cst = arith.constant dense<0.000000e+00> : vector<1x12xf32>
    %8 = vector.multi_reduction <add>, %3, %cst [2] : vector<1x12x64xf32> to vector<1x12xf32>
    %9 = vector.shape_cast %8 : vector<1x12xf32> to vector<1x12x1xf32>
    %cst_9 = arith.constant 6.400000e+01 : f32
    %10 = vector.broadcast %cst_9 : f32 to vector<1x12x1xf32>
    %11 = arith.divf %9, %10 : vector<1x12x1xf32>
    %12 = vector.broadcast %11 : vector<1x12x1xf32> to vector<1x12x64xf32>
    %13 = arith.subf %3, %12 : vector<1x12x64xf32>
    %14 = arith.mulf %13, %13 : vector<1x12x64xf32>
    %cst_10 = arith.constant dense<0.000000e+00> : vector<1x12xf32>
    %15 = vector.multi_reduction <add>, %14, %cst_10 [2] : vector<1x12x64xf32> to vector<1x12xf32>
    %16 = vector.shape_cast %15 : vector<1x12xf32> to vector<1x12x1xf32>
    %cst_11 = arith.constant 6.400000e+01 : f32
    %17 = vector.broadcast %cst_11 : f32 to vector<1x12x1xf32>
    %18 = arith.divf %16, %17 : vector<1x12x1xf32>
    %19 = vector.broadcast %11 : vector<1x12x1xf32> to vector<1x12x64xf32>
    %20 = arith.subf %3, %19 : vector<1x12x64xf32>
    %cst_12 = arith.constant 9.99999974E-6 : f32
    %21 = vector.broadcast %cst_12 : f32 to vector<1x12x1xf32>
    %22 = arith.addf %18, %21 : vector<1x12x1xf32>
    %23 = math.rsqrt %22 : vector<1x12x1xf32>
    %24 = vector.broadcast %23 : vector<1x12x1xf32> to vector<1x12x64xf32>
    %25 = arith.mulf %20, %24 : vector<1x12x64xf32>
    %26 = vector.shape_cast %5 : vector<1x64xf32> to vector<1x1x64xf32>
    %27 = vector.broadcast %26 : vector<1x1x64xf32> to vector<1x12x64xf32>
    %28 = arith.mulf %25, %27 : vector<1x12x64xf32>
    %29 = vector.shape_cast %7 : vector<1x64xf32> to vector<1x1x64xf32>
    %30 = vector.broadcast %29 : vector<1x1x64xf32> to vector<1x12x64xf32>
    %31 = arith.addf %28, %30 : vector<1x12x64xf32>
    %32 = vector.shape_cast %31 : vector<1x12x64xf32> to vector<12x64xf32>
    %33 = arith.truncf %32 : vector<12x64xf32> to vector<12x64xbf16>
    %c0_13 = arith.constant 0 : index
    %c0_14 = arith.constant 0 : index
    %c0_15 = arith.constant 0 : index
    %34 = vector.load %arg7[%c0_13, %c0_14, %c0_15] : memref<1x64x192xbf16, #tpu.memory_space<vmem>>, vector<1x64x192xbf16>
    %35 = vector.shape_cast %34 : vector<1x64x192xbf16> to vector<64x192xbf16>
    %cst_16 = arith.constant dense<0.000000e+00> : vector<12x192xf32>
    %36 = tpu.matmul %33, %35, %cst_16 {dimension_numbers = #tpu.dot_dimension_numbers<[1], [0], [0], [1], [0, 0, 1, 1], [], []>} : vector<12x64xbf16>, vector<64x192xbf16>, vector<12x192xf32> -> vector<12x192xf32>
    %c0_17 = arith.constant 0 : index
    %c0_18 = arith.constant 0 : index
    %c0_19 = arith.constant 0 : index
    %37 = vector.load %arg8[%c0_17, %c0_18, %c0_19] : memref<1x1x192xf32, #tpu.memory_space<vmem>>, vector<1x1x192xf32>
    %38 = vector.shape_cast %37 : vector<1x1x192xf32> to vector<1x192xf32>
    %39 = vector.broadcast %38 : vector<1x192xf32> to vector<12x192xf32>
    %40 = arith.addf %36, %39 : vector<12x192xf32>
    %41 = vector.shape_cast %40 : vector<12x192xf32> to vector<1x12x192xf32>
    %42 = vector.extract_strided_slice %41 {offsets = [0, 0, 0], sizes = [1, 12, 64], strides = [1, 1, 1]} : vector<1x12x192xf32> to vector<1x12x64xf32>
    %43 = vector.shape_cast %42 : vector<1x12x64xf32> to vector<12x64xf32>
    %44 = vector.extract_strided_slice %41 {offsets = [0, 0, 64], sizes = [1, 12, 64], strides = [1, 1, 1]} : vector<1x12x192xf32> to vector<1x12x64xf32>
    %45 = vector.shape_cast %44 : vector<1x12x64xf32> to vector<12x64xf32>
    %46 = arith.truncf %45 : vector<12x64xf32> to vector<12x64xbf16>
    %47 = vector.extract_strided_slice %41 {offsets = [0, 0, 128], sizes = [1, 12, 64], strides = [1, 1, 1]} : vector<1x12x192xf32> to vector<1x12x64xf32>
    %48 = vector.shape_cast %47 : vector<1x12x64xf32> to vector<12x64xf32>
    %49 = arith.truncf %48 : vector<12x64xf32> to vector<12x64xbf16>
    %50 = vector.extract_strided_slice %43 {offsets = [0, 0], sizes = [12, 16], strides = [1, 1]} : vector<12x64xf32> to vector<12x16xf32>
    %cst_20 = arith.constant 2.500000e-01 : f32
    %51 = vector.broadcast %cst_20 : f32 to vector<12x16xf32>
    %52 = arith.mulf %50, %51 : vector<12x16xf32>
    %53 = arith.truncf %52 : vector<12x16xf32> to vector<12x16xbf16>
    %54 = vector.extract_strided_slice %46 {offsets = [0, 0], sizes = [12, 16], strides = [1, 1]} : vector<12x64xbf16> to vector<12x16xbf16>
    %55 = vector.extract_strided_slice %49 {offsets = [0, 0], sizes = [12, 16], strides = [1, 1]} : vector<12x64xbf16> to vector<12x16xbf16>
    %cst_21 = arith.constant dense<0.000000e+00> : vector<12x12xf32>
    %56 = tpu.matmul %53, %54, %cst_21 {dimension_numbers = #tpu.dot_dimension_numbers<[1], [1], [0], [0], [0, 0, 1, 0], [], []>} : vector<12x16xbf16>, vector<12x16xbf16>, vector<12x12xf32> -> vector<12x12xf32>
    %cst_22 = arith.constant dense<0xFF800000> : vector<12xf32>
    %57 = vector.multi_reduction <maximumf>, %56, %cst_22 [1] : vector<12x12xf32> to vector<12xf32>
    %58 = vector.shape_cast %57 : vector<12xf32> to vector<12x1xf32>
    %59 = vector.broadcast %58 : vector<12x1xf32> to vector<12x12xf32>
    %60 = arith.subf %56, %59 : vector<12x12xf32>
    %61 = math.exp %60 : vector<12x12xf32>
    %cst_23 = arith.constant dense<0.000000e+00> : vector<12xf32>
    %62 = vector.multi_reduction <add>, %61, %cst_23 [1] : vector<12x12xf32> to vector<12xf32>
    %63 = vector.shape_cast %62 : vector<12xf32> to vector<12x1xf32>
    %64 = tpu.reciprocal %63 {approx = true} : vector<12x1xf32> -> vector<12x1xf32>
    %65 = arith.truncf %61 : vector<12x12xf32> to vector<12x12xbf16>
    %cst_24 = arith.constant dense<0.000000e+00> : vector<12x16xf32>
    %66 = tpu.matmul %65, %55, %cst_24 {dimension_numbers = #tpu.dot_dimension_numbers<[1], [0], [0], [1], [0, 0, 1, 1], [], []>} : vector<12x12xbf16>, vector<12x16xbf16>, vector<12x16xf32> -> vector<12x16xf32>
    %67 = vector.broadcast %64 : vector<12x1xf32> to vector<12x16xf32>
    %68 = arith.mulf %66, %67 : vector<12x16xf32>
    %c0_25 = arith.constant 0 : index
    %c0_26 = arith.constant 0 : index
    %c0_27 = arith.constant 0 : index
    %69 = vector.load %arg22[%c0_25, %c0_26, %c0_27] : memref<1x12x64xf32, #tpu.memory_space<vmem>>, vector<1x12x16xf32>
    %70 = vector.shape_cast %69 : vector<1x12x16xf32> to vector<12x16xf32>
    %71 = vector.shape_cast %68 : vector<12x16xf32> to vector<1x12x16xf32>
    tpu.vector_store %arg22[%c0_25, %c0_26, %c0_27], %71 {strides = array<i32>} : memref<1x12x64xf32, #tpu.memory_space<vmem>>, vector<1x12x16xf32>,
    %72 = vector.extract_strided_slice %43 {offsets = [0, 16], sizes = [12, 16], strides = [1, 1]} : vector<12x64xf32> to vector<12x16xf32>
    %cst_28 = arith.constant 2.500000e-01 : f32
    %73 = vector.broadcast %cst_28 : f32 to vector<12x16xf32>
    %74 = arith.mulf %72, %73 : vector<12x16xf32>
    %75 = arith.truncf %74 : vector<12x16xf32> to vector<12x16xbf16>
    %76 = vector.extract_strided_slice %46 {offsets = [0, 16], sizes = [12, 16], strides = [1, 1]} : vector<12x64xbf16> to vector<12x16xbf16>
    %77 = vector.extract_strided_slice %49 {offsets = [0, 16], sizes = [12, 16], strides = [1, 1]} : vector<12x64xbf16> to vector<12x16xbf16>
    %cst_29 = arith.constant dense<0.000000e+00> : vector<12x12xf32>
    %78 = tpu.matmul %75, %76, %cst_29 {dimension_numbers = #tpu.dot_dimension_numbers<[1], [1], [0], [0], [0, 0, 1, 0], [], []>} : vector<12x16xbf16>, vector<12x16xbf16>, vector<12x12xf32> -> vector<12x12xf32>
    %cst_30 = arith.constant dense<0xFF800000> : vector<12xf32>
    %79 = vector.multi_reduction <maximumf>, %78, %cst_30 [1] : vector<12x12xf32> to vector<12xf32>
    %80 = vector.shape_cast %79 : vector<12xf32> to vector<12x1xf32>
    %81 = vector.broadcast %80 : vector<12x1xf32> to vector<12x12xf32>
    %82 = arith.subf %78, %81 : vector<12x12xf32>
    %83 = math.exp %82 : vector<12x12xf32>
    %cst_31 = arith.constant dense<0.000000e+00> : vector<12xf32>
    %84 = vector.multi_reduction <add>, %83, %cst_31 [1] : vector<12x12xf32> to vector<12xf32>
    %85 = vector.shape_cast %84 : vector<12xf32> to vector<12x1xf32>
    %86 = tpu.reciprocal %85 {approx = true} : vector<12x1xf32> -> vector<12x1xf32>
    %87 = arith.truncf %83 : vector<12x12xf32> to vector<12x12xbf16>
    %cst_32 = arith.constant dense<0.000000e+00> : vector<12x16xf32>
    %88 = tpu.matmul %87, %77, %cst_32 {dimension_numbers = #tpu.dot_dimension_numbers<[1], [0], [0], [1], [0, 0, 1, 1], [], []>} : vector<12x12xbf16>, vector<12x16xbf16>, vector<12x16xf32> -> vector<12x16xf32>
    %89 = vector.broadcast %86 : vector<12x1xf32> to vector<12x16xf32>
    %90 = arith.mulf %88, %89 : vector<12x16xf32>
    %c0_33 = arith.constant 0 : index
    %c0_34 = arith.constant 0 : index
    %c16 = arith.constant 16 : index
    %91 = vector.load %arg22[%c0_33, %c0_34, %c16] : memref<1x12x64xf32, #tpu.memory_space<vmem>>, vector<1x12x16xf32>
    %92 = vector.shape_cast %91 : vector<1x12x16xf32> to vector<12x16xf32>
    %93 = vector.shape_cast %90 : vector<12x16xf32> to vector<1x12x16xf32>
    tpu.vector_store %arg22[%c0_33, %c0_34, %c16], %93 {strides = array<i32>} : memref<1x12x64xf32, #tpu.memory_space<vmem>>, vector<1x12x16xf32>,
    %94 = vector.extract_strided_slice %43 {offsets = [0, 32], sizes = [12, 16], strides = [1, 1]} : vector<12x64xf32> to vector<12x16xf32>
    %cst_35 = arith.constant 2.500000e-01 : f32
    %95 = vector.broadcast %cst_35 : f32 to vector<12x16xf32>
    %96 = arith.mulf %94, %95 : vector<12x16xf32>
    %97 = arith.truncf %96 : vector<12x16xf32> to vector<12x16xbf16>
    %98 = vector.extract_strided_slice %46 {offsets = [0, 32], sizes = [12, 16], strides = [1, 1]} : vector<12x64xbf16> to vector<12x16xbf16>
    %99 = vector.extract_strided_slice %49 {offsets = [0, 32], sizes = [12, 16], strides = [1, 1]} : vector<12x64xbf16> to vector<12x16xbf16>
    %cst_36 = arith.constant dense<0.000000e+00> : vector<12x12xf32>
    %100 = tpu.matmul %97, %98, %cst_36 {dimension_numbers = #tpu.dot_dimension_numbers<[1], [1], [0], [0], [0, 0, 1, 0], [], []>} : vector<12x16xbf16>, vector<12x16xbf16>, vector<12x12xf32> -> vector<12x12xf32>
    %cst_37 = arith.constant dense<0xFF800000> : vector<12xf32>
    %101 = vector.multi_reduction <maximumf>, %100, %cst_37 [1] : vector<12x12xf32> to vector<12xf32>
    %102 = vector.shape_cast %101 : vector<12xf32> to vector<12x1xf32>
    %103 = vector.broadcast %102 : vector<12x1xf32> to vector<12x12xf32>
    %104 = arith.subf %100, %103 : vector<12x12xf32>
    %105 = math.exp %104 : vector<12x12xf32>
    %cst_38 = arith.constant dense<0.000000e+00> : vector<12xf32>
    %106 = vector.multi_reduction <add>, %105, %cst_38 [1] : vector<12x12xf32> to vector<12xf32>
    %107 = vector.shape_cast %106 : vector<12xf32> to vector<12x1xf32>
    %108 = tpu.reciprocal %107 {approx = true} : vector<12x1xf32> -> vector<12x1xf32>
    %109 = arith.truncf %105 : vector<12x12xf32> to vector<12x12xbf16>
    %cst_39 = arith.constant dense<0.000000e+00> : vector<12x16xf32>
    %110 = tpu.matmul %109, %99, %cst_39 {dimension_numbers = #tpu.dot_dimension_numbers<[1], [0], [0], [1], [0, 0, 1, 1], [], []>} : vector<12x12xbf16>, vector<12x16xbf16>, vector<12x16xf32> -> vector<12x16xf32>
    %111 = vector.broadcast %108 : vector<12x1xf32> to vector<12x16xf32>
    %112 = arith.mulf %110, %111 : vector<12x16xf32>
    %c0_40 = arith.constant 0 : index
    %c0_41 = arith.constant 0 : index
    %c32 = arith.constant 32 : index
    %113 = vector.load %arg22[%c0_40, %c0_41, %c32] : memref<1x12x64xf32, #tpu.memory_space<vmem>>, vector<1x12x16xf32>
    %114 = vector.shape_cast %113 : vector<1x12x16xf32> to vector<12x16xf32>
    %115 = vector.shape_cast %112 : vector<12x16xf32> to vector<1x12x16xf32>
    tpu.vector_store %arg22[%c0_40, %c0_41, %c32], %115 {strides = array<i32>} : memref<1x12x64xf32, #tpu.memory_space<vmem>>, vector<1x12x16xf32>,
    %116 = vector.extract_strided_slice %43 {offsets = [0, 48], sizes = [12, 16], strides = [1, 1]} : vector<12x64xf32> to vector<12x16xf32>
    %cst_42 = arith.constant 2.500000e-01 : f32
    %117 = vector.broadcast %cst_42 : f32 to vector<12x16xf32>
    %118 = arith.mulf %116, %117 : vector<12x16xf32>
    %119 = arith.truncf %118 : vector<12x16xf32> to vector<12x16xbf16>
    %120 = vector.extract_strided_slice %46 {offsets = [0, 48], sizes = [12, 16], strides = [1, 1]} : vector<12x64xbf16> to vector<12x16xbf16>
    %121 = vector.extract_strided_slice %49 {offsets = [0, 48], sizes = [12, 16], strides = [1, 1]} : vector<12x64xbf16> to vector<12x16xbf16>
    %cst_43 = arith.constant dense<0.000000e+00> : vector<12x12xf32>
    %122 = tpu.matmul %119, %120, %cst_43 {dimension_numbers = #tpu.dot_dimension_numbers<[1], [1], [0], [0], [0, 0, 1, 0], [], []>} : vector<12x16xbf16>, vector<12x16xbf16>, vector<12x12xf32> -> vector<12x12xf32>
    %cst_44 = arith.constant dense<0xFF800000> : vector<12xf32>
    %123 = vector.multi_reduction <maximumf>, %122, %cst_44 [1] : vector<12x12xf32> to vector<12xf32>
    %124 = vector.shape_cast %123 : vector<12xf32> to vector<12x1xf32>
    %125 = vector.broadcast %124 : vector<12x1xf32> to vector<12x12xf32>
    %126 = arith.subf %122, %125 : vector<12x12xf32>
    %127 = math.exp %126 : vector<12x12xf32>
    %cst_45 = arith.constant dense<0.000000e+00> : vector<12xf32>
    %128 = vector.multi_reduction <add>, %127, %cst_45 [1] : vector<12x12xf32> to vector<12xf32>
    %129 = vector.shape_cast %128 : vector<12xf32> to vector<12x1xf32>
    %130 = tpu.reciprocal %129 {approx = true} : vector<12x1xf32> -> vector<12x1xf32>
    %131 = arith.truncf %127 : vector<12x12xf32> to vector<12x12xbf16>
    %cst_46 = arith.constant dense<0.000000e+00> : vector<12x16xf32>
    %132 = tpu.matmul %131, %121, %cst_46 {dimension_numbers = #tpu.dot_dimension_numbers<[1], [0], [0], [1], [0, 0, 1, 1], [], []>} : vector<12x12xbf16>, vector<12x16xbf16>, vector<12x16xf32> -> vector<12x16xf32>
    %133 = vector.broadcast %130 : vector<12x1xf32> to vector<12x16xf32>
    %134 = arith.mulf %132, %133 : vector<12x16xf32>
    %c0_47 = arith.constant 0 : index
    %c0_48 = arith.constant 0 : index
    %c48 = arith.constant 48 : index
    %135 = vector.load %arg22[%c0_47, %c0_48, %c48] : memref<1x12x64xf32, #tpu.memory_space<vmem>>, vector<1x12x16xf32>
    %136 = vector.shape_cast %135 : vector<1x12x16xf32> to vector<12x16xf32>
    %137 = vector.shape_cast %134 : vector<12x16xf32> to vector<1x12x16xf32>
    tpu.vector_store %arg22[%c0_47, %c0_48, %c48], %137 {strides = array<i32>} : memref<1x12x64xf32, #tpu.memory_space<vmem>>, vector<1x12x16xf32>,
    %c0_49 = arith.constant 0 : index
    %c0_50 = arith.constant 0 : index
    %c0_51 = arith.constant 0 : index
    %138 = vector.load %arg22[%c0_49, %c0_50, %c0_51] : memref<1x12x64xf32, #tpu.memory_space<vmem>>, vector<1x12x64xf32>
    %139 = vector.shape_cast %138 : vector<1x12x64xf32> to vector<12x64xf32>
    %140 = arith.truncf %139 : vector<12x64xf32> to vector<12x64xbf16>
    %c0_52 = arith.constant 0 : index
    %c0_53 = arith.constant 0 : index
    %c0_54 = arith.constant 0 : index
    %141 = vector.load %arg9[%c0_52, %c0_53, %c0_54] : memref<1x64x64xbf16, #tpu.memory_space<vmem>>, vector<1x64x64xbf16>
    %142 = vector.shape_cast %141 : vector<1x64x64xbf16> to vector<64x64xbf16>
    %cst_55 = arith.constant dense<0.000000e+00> : vector<12x64xf32>
    %143 = tpu.matmul %140, %142, %cst_55 {dimension_numbers = #tpu.dot_dimension_numbers<[1], [0], [0], [1], [0, 0, 1, 1], [], []>} : vector<12x64xbf16>, vector<64x64xbf16>, vector<12x64xf32> -> vector<12x64xf32>
    %c0_56 = arith.constant 0 : index
    %c0_57 = arith.constant 0 : index
    %c0_58 = arith.constant 0 : index
    %144 = vector.load %arg10[%c0_56, %c0_57, %c0_58] : memref<1x1x64xf32, #tpu.memory_space<vmem>>, vector<1x1x64xf32>
    %145 = vector.shape_cast %144 : vector<1x1x64xf32> to vector<1x64xf32>
    %146 = vector.broadcast %145 : vector<1x64xf32> to vector<12x64xf32>
    %147 = arith.addf %143, %146 : vector<12x64xf32>
    %148 = vector.shape_cast %147 : vector<12x64xf32> to vector<1x12x64xf32>
    %149 = arith.addf %3, %148 : vector<1x12x64xf32>
    %c0_59 = arith.constant 0 : index
    %c0_60 = arith.constant 0 : index
    %c0_61 = arith.constant 0 : index
    %150 = vector.load %arg11[%c0_59, %c0_60, %c0_61] : memref<1x1x64xf32, #tpu.memory_space<vmem>>, vector<1x1x64xf32>
    %151 = vector.shape_cast %150 : vector<1x1x64xf32> to vector<1x64xf32>
    %c0_62 = arith.constant 0 : index
    %c0_63 = arith.constant 0 : index
    %c0_64 = arith.constant 0 : index
    %152 = vector.load %arg12[%c0_62, %c0_63, %c0_64] : memref<1x1x64xf32, #tpu.memory_space<vmem>>, vector<1x1x64xf32>
    %153 = vector.shape_cast %152 : vector<1x1x64xf32> to vector<1x64xf32>
    %cst_65 = arith.constant dense<0.000000e+00> : vector<1x12xf32>
    %154 = vector.multi_reduction <add>, %149, %cst_65 [2] : vector<1x12x64xf32> to vector<1x12xf32>
    %155 = vector.shape_cast %154 : vector<1x12xf32> to vector<1x12x1xf32>
    %cst_66 = arith.constant 6.400000e+01 : f32
    %156 = vector.broadcast %cst_66 : f32 to vector<1x12x1xf32>
    %157 = arith.divf %155, %156 : vector<1x12x1xf32>
    %158 = vector.broadcast %157 : vector<1x12x1xf32> to vector<1x12x64xf32>
    %159 = arith.subf %149, %158 : vector<1x12x64xf32>
    %160 = arith.mulf %159, %159 : vector<1x12x64xf32>
    %cst_67 = arith.constant dense<0.000000e+00> : vector<1x12xf32>
    %161 = vector.multi_reduction <add>, %160, %cst_67 [2] : vector<1x12x64xf32> to vector<1x12xf32>
    %162 = vector.shape_cast %161 : vector<1x12xf32> to vector<1x12x1xf32>
    %cst_68 = arith.constant 6.400000e+01 : f32
    %163 = vector.broadcast %cst_68 : f32 to vector<1x12x1xf32>
    %164 = arith.divf %162, %163 : vector<1x12x1xf32>
    %165 = vector.broadcast %157 : vector<1x12x1xf32> to vector<1x12x64xf32>
    %166 = arith.subf %149, %165 : vector<1x12x64xf32>
    %cst_69 = arith.constant 9.99999974E-6 : f32
    %167 = vector.broadcast %cst_69 : f32 to vector<1x12x1xf32>
    %168 = arith.addf %164, %167 : vector<1x12x1xf32>
    %169 = math.rsqrt %168 : vector<1x12x1xf32>
    %170 = vector.broadcast %169 : vector<1x12x1xf32> to vector<1x12x64xf32>
    %171 = arith.mulf %166, %170 : vector<1x12x64xf32>
    %172 = vector.shape_cast %151 : vector<1x64xf32> to vector<1x1x64xf32>
    %173 = vector.broadcast %172 : vector<1x1x64xf32> to vector<1x12x64xf32>
    %174 = arith.mulf %171, %173 : vector<1x12x64xf32>
    %175 = vector.shape_cast %153 : vector<1x64xf32> to vector<1x1x64xf32>
    %176 = vector.broadcast %175 : vector<1x1x64xf32> to vector<1x12x64xf32>
    %177 = arith.addf %174, %176 : vector<1x12x64xf32>
    %178 = vector.shape_cast %177 : vector<1x12x64xf32> to vector<12x64xf32>
    %179 = arith.truncf %178 : vector<12x64xf32> to vector<12x64xbf16>
    %c0_70 = arith.constant 0 : index
    %c0_71 = arith.constant 0 : index
    %c0_72 = arith.constant 0 : index
    %180 = vector.load %arg13[%c0_70, %c0_71, %c0_72] : memref<1x64x256xbf16, #tpu.memory_space<vmem>>, vector<1x64x256xbf16>
    %181 = vector.shape_cast %180 : vector<1x64x256xbf16> to vector<64x256xbf16>
    %cst_73 = arith.constant dense<0.000000e+00> : vector<12x256xf32>
    %182 = tpu.matmul %179, %181, %cst_73 {dimension_numbers = #tpu.dot_dimension_numbers<[1], [0], [0], [1], [0, 0, 1, 1], [], []>} : vector<12x64xbf16>, vector<64x256xbf16>, vector<12x256xf32> -> vector<12x256xf32>
    %c0_74 = arith.constant 0 : index
    %c0_75 = arith.constant 0 : index
    %c0_76 = arith.constant 0 : index
    %183 = vector.load %arg14[%c0_74, %c0_75, %c0_76] : memref<1x1x256xf32, #tpu.memory_space<vmem>>, vector<1x1x256xf32>
    %184 = vector.shape_cast %183 : vector<1x1x256xf32> to vector<1x256xf32>
    %185 = vector.broadcast %184 : vector<1x256xf32> to vector<12x256xf32>
    %186 = arith.addf %182, %185 : vector<12x256xf32>
    %cst_77 = arith.constant 1.702000e+00 : f32
    %187 = vector.broadcast %cst_77 : f32 to vector<12x256xf32>
    %188 = arith.mulf %187, %186 : vector<12x256xf32>
    %189 = arith.negf %188 : vector<12x256xf32>
    %190 = math.exp %189 : vector<12x256xf32>
    %cst_78 = arith.constant 1.000000e+00 : f32
    %191 = vector.broadcast %cst_78 : f32 to vector<12x256xf32>
    %192 = arith.addf %191, %190 : vector<12x256xf32>
    %193 = arith.divf %191, %192 : vector<12x256xf32>
    %194 = arith.mulf %186, %193 : vector<12x256xf32>
    %195 = arith.truncf %194 : vector<12x256xf32> to vector<12x256xbf16>
    %c0_79 = arith.constant 0 : index
    %c0_80 = arith.constant 0 : index
    %c0_81 = arith.constant 0 : index
    %196 = vector.load %arg15[%c0_79, %c0_80, %c0_81] : memref<1x256x64xbf16, #tpu.memory_space<vmem>>, vector<1x256x64xbf16>
    %197 = vector.shape_cast %196 : vector<1x256x64xbf16> to vector<256x64xbf16>
    %cst_82 = arith.constant dense<0.000000e+00> : vector<12x64xf32>
    %198 = tpu.matmul %195, %197, %cst_82 {dimension_numbers = #tpu.dot_dimension_numbers<[1], [0], [0], [1], [0, 0, 1, 1], [], []>} : vector<12x256xbf16>, vector<256x64xbf16>, vector<12x64xf32> -> vector<12x64xf32>
    %c0_83 = arith.constant 0 : index
    %c0_84 = arith.constant 0 : index
    %c0_85 = arith.constant 0 : index
    %199 = vector.load %arg16[%c0_83, %c0_84, %c0_85] : memref<1x1x64xf32, #tpu.memory_space<vmem>>, vector<1x1x64xf32>
    %200 = vector.shape_cast %199 : vector<1x1x64xf32> to vector<1x64xf32>
    %201 = vector.broadcast %200 : vector<1x64xf32> to vector<12x64xf32>
    %202 = arith.addf %198, %201 : vector<12x64xf32>
    %203 = vector.shape_cast %202 : vector<12x64xf32> to vector<1x12x64xf32>
    %204 = arith.addf %149, %203 : vector<1x12x64xf32>
    %c0_86 = arith.constant 0 : index
    %c0_87 = arith.constant 0 : index
    %c0_88 = arith.constant 0 : index
    %205 = vector.load %arg21[%c0_86, %c0_87, %c0_88] : memref<1x12x64xf32, #tpu.memory_space<vmem>>, vector<1x12x64xf32>
    tpu.vector_store %arg21[%c0_86, %c0_87, %c0_88], %204 {strides = array<i32>} : memref<1x12x64xf32, #tpu.memory_space<vmem>>, vector<1x12x64xf32>,
    %c1_i32 = arith.constant 1 : i32
    %206 = arith.cmpi eq, %arg1, %c1_i32 : i32
    %207 = arith.extui %206 : i1 to i32
    %c0_i32_89 = arith.constant 0 : i32
    %208 = arith.cmpi ne, %207, %c0_i32_89 : i32
    scf.if %208 {
      %209 = vector.extract_strided_slice %204 {offsets = [0, 8, 0], sizes = [1, 4, 64], strides = [1, 1, 1]} : vector<1x12x64xf32> to vector<1x4x64xf32>
      %c0_90 = arith.constant 0 : index
      %c0_91 = arith.constant 0 : index
      %210 = vector.load %arg17[%c0_90, %c0_91] : memref<1x64xf32, #tpu.memory_space<vmem>>, vector<1x64xf32>
      %c0_92 = arith.constant 0 : index
      %c0_93 = arith.constant 0 : index
      %211 = vector.load %arg18[%c0_92, %c0_93] : memref<1x64xf32, #tpu.memory_space<vmem>>, vector<1x64xf32>
      %cst_94 = arith.constant dense<0.000000e+00> : vector<1x4xf32>
      %212 = vector.multi_reduction <add>, %209, %cst_94 [2] : vector<1x4x64xf32> to vector<1x4xf32>
      %213 = vector.shape_cast %212 : vector<1x4xf32> to vector<1x4x1xf32>
      %cst_95 = arith.constant 6.400000e+01 : f32
      %214 = vector.broadcast %cst_95 : f32 to vector<1x4x1xf32>
      %215 = arith.divf %213, %214 : vector<1x4x1xf32>
      %216 = vector.broadcast %215 : vector<1x4x1xf32> to vector<1x4x64xf32>
      %217 = arith.subf %209, %216 : vector<1x4x64xf32>
      %218 = arith.mulf %217, %217 : vector<1x4x64xf32>
      %cst_96 = arith.constant dense<0.000000e+00> : vector<1x4xf32>
      %219 = vector.multi_reduction <add>, %218, %cst_96 [2] : vector<1x4x64xf32> to vector<1x4xf32>
      %220 = vector.shape_cast %219 : vector<1x4xf32> to vector<1x4x1xf32>
      %cst_97 = arith.constant 6.400000e+01 : f32
      %221 = vector.broadcast %cst_97 : f32 to vector<1x4x1xf32>
      %222 = arith.divf %220, %221 : vector<1x4x1xf32>
      %223 = vector.broadcast %215 : vector<1x4x1xf32> to vector<1x4x64xf32>
      %224 = arith.subf %209, %223 : vector<1x4x64xf32>
      %cst_98 = arith.constant 9.99999974E-6 : f32
      %225 = vector.broadcast %cst_98 : f32 to vector<1x4x1xf32>
      %226 = arith.addf %222, %225 : vector<1x4x1xf32>
      %227 = math.rsqrt %226 : vector<1x4x1xf32>
      %228 = vector.broadcast %227 : vector<1x4x1xf32> to vector<1x4x64xf32>
      %229 = arith.mulf %224, %228 : vector<1x4x64xf32>
      %230 = vector.shape_cast %210 : vector<1x64xf32> to vector<1x1x64xf32>
      %231 = vector.broadcast %230 : vector<1x1x64xf32> to vector<1x4x64xf32>
      %232 = arith.mulf %229, %231 : vector<1x4x64xf32>
      %233 = vector.shape_cast %211 : vector<1x64xf32> to vector<1x1x64xf32>
      %234 = vector.broadcast %233 : vector<1x1x64xf32> to vector<1x4x64xf32>
      %235 = arith.addf %232, %234 : vector<1x4x64xf32>
      %236 = vector.shape_cast %235 : vector<1x4x64xf32> to vector<4x64xf32>
      %237 = arith.truncf %236 : vector<4x64xf32> to vector<4x64xbf16>
      %c0_99 = arith.constant 0 : index
      %c0_100 = arith.constant 0 : index
      %238 = vector.load %arg19[%c0_99, %c0_100] : memref<64x32xbf16, #tpu.memory_space<vmem>>, vector<64x32xbf16>
      %cst_101 = arith.constant dense<0.000000e+00> : vector<4x32xf32>
      %239 = tpu.matmul %237, %238, %cst_101 {dimension_numbers = #tpu.dot_dimension_numbers<[1], [0], [0], [1], [0, 0, 1, 1], [], []>} : vector<4x64xbf16>, vector<64x32xbf16>, vector<4x32xf32> -> vector<4x32xf32>
      %240 = vector.shape_cast %239 : vector<4x32xf32> to vector<1x4x32xf32>
      %c0_102 = arith.constant 0 : index
      %c0_103 = arith.constant 0 : index
      %c0_104 = arith.constant 0 : index
      %241 = vector.load %arg20[%c0_102, %c0_103, %c0_104] : memref<1x4x32xf32, #tpu.memory_space<vmem>>, vector<1x4x32xf32>
      tpu.vector_store %arg20[%c0_102, %c0_103, %c0_104], %240 {strides = array<i32>} : memref<1x4x32xf32, #tpu.memory_space<vmem>>, vector<1x4x32xf32>,
    } else {
    }
    return
  }
  func.func @transform_0(%arg0: i32, %arg1: i32) -> (i32, i32, i32) {
    %c0_i32 = arith.constant 0 : i32
    %c0_i32_0 = arith.constant 0 : i32
    %c0_i32_1 = arith.constant 0 : i32
    return %arg0, %c0_i32, %c0_i32_0 : i32, i32, i32
  }
  func.func @transform_1(%arg0: i32, %arg1: i32) -> (i32, i32) {
    %c0_i32 = arith.constant 0 : i32
    %c0_i32_0 = arith.constant 0 : i32
    %c0_i32_1 = arith.constant 0 : i32
    return %c0_i32, %c0_i32_0 : i32, i32
  }
  func.func @transform_2(%arg0: i32, %arg1: i32) -> (i32, i32) {
    %c0_i32 = arith.constant 0 : i32
    %c0_i32_0 = arith.constant 0 : i32
    %c0_i32_1 = arith.constant 0 : i32
    return %c0_i32, %c0_i32_0 : i32, i32
  }
  func.func @transform_3(%arg0: i32, %arg1: i32) -> (i32, i32, i32) {
    %c0_i32 = arith.constant 0 : i32
    %c0_i32_0 = arith.constant 0 : i32
    %c0_i32_1 = arith.constant 0 : i32
    return %arg1, %c0_i32, %c0_i32_0 : i32, i32, i32
  }
  func.func @transform_4(%arg0: i32, %arg1: i32) -> (i32, i32, i32) {
    %c0_i32 = arith.constant 0 : i32
    %c0_i32_0 = arith.constant 0 : i32
    %c0_i32_1 = arith.constant 0 : i32
    return %arg1, %c0_i32, %c0_i32_0 : i32, i32, i32
  }
  func.func @transform_5(%arg0: i32, %arg1: i32) -> (i32, i32, i32) {
    %c0_i32 = arith.constant 0 : i32
    %c0_i32_0 = arith.constant 0 : i32
    %c0_i32_1 = arith.constant 0 : i32
    return %arg1, %c0_i32, %c0_i32_0 : i32, i32, i32
  }
  func.func @transform_6(%arg0: i32, %arg1: i32) -> (i32, i32, i32) {
    %c0_i32 = arith.constant 0 : i32
    %c0_i32_0 = arith.constant 0 : i32
    %c0_i32_1 = arith.constant 0 : i32
    return %arg1, %c0_i32, %c0_i32_0 : i32, i32, i32
  }
  func.func @transform_7(%arg0: i32, %arg1: i32) -> (i32, i32, i32) {
    %c0_i32 = arith.constant 0 : i32
    %c0_i32_0 = arith.constant 0 : i32
    %c0_i32_1 = arith.constant 0 : i32
    return %arg1, %c0_i32, %c0_i32_0 : i32, i32, i32
  }
  func.func @transform_8(%arg0: i32, %arg1: i32) -> (i32, i32, i32) {
    %c0_i32 = arith.constant 0 : i32
    %c0_i32_0 = arith.constant 0 : i32
    %c0_i32_1 = arith.constant 0 : i32
    return %arg1, %c0_i32, %c0_i32_0 : i32, i32, i32
  }
  func.func @transform_9(%arg0: i32, %arg1: i32) -> (i32, i32, i32) {
    %c0_i32 = arith.constant 0 : i32
    %c0_i32_0 = arith.constant 0 : i32
    %c0_i32_1 = arith.constant 0 : i32
    return %arg1, %c0_i32, %c0_i32_0 : i32, i32, i32
  }
  func.func @transform_10(%arg0: i32, %arg1: i32) -> (i32, i32, i32) {
    %c0_i32 = arith.constant 0 : i32
    %c0_i32_0 = arith.constant 0 : i32
    %c0_i32_1 = arith.constant 0 : i32
    return %arg1, %c0_i32, %c0_i32_0 : i32, i32, i32
  }
  func.func @transform_11(%arg0: i32, %arg1: i32) -> (i32, i32, i32) {
    %c0_i32 = arith.constant 0 : i32
    %c0_i32_0 = arith.constant 0 : i32
    %c0_i32_1 = arith.constant 0 : i32
    return %arg1, %c0_i32, %c0_i32_0 : i32, i32, i32
  }
  func.func @transform_12(%arg0: i32, %arg1: i32) -> (i32, i32, i32) {
    %c0_i32 = arith.constant 0 : i32
    %c0_i32_0 = arith.constant 0 : i32
    %c0_i32_1 = arith.constant 0 : i32
    return %arg1, %c0_i32, %c0_i32_0 : i32, i32, i32
  }
  func.func @transform_13(%arg0: i32, %arg1: i32) -> (i32, i32, i32) {
    %c0_i32 = arith.constant 0 : i32
    %c0_i32_0 = arith.constant 0 : i32
    %c0_i32_1 = arith.constant 0 : i32
    return %arg1, %c0_i32, %c0_i32_0 : i32, i32, i32
  }
  func.func @transform_14(%arg0: i32, %arg1: i32) -> (i32, i32, i32) {
    %c0_i32 = arith.constant 0 : i32
    %c0_i32_0 = arith.constant 0 : i32
    %c0_i32_1 = arith.constant 0 : i32
    return %arg1, %c0_i32, %c0_i32_0 : i32, i32, i32
  }
  func.func @transform_15(%arg0: i32, %arg1: i32) -> (i32, i32) {
    %c0_i32 = arith.constant 0 : i32
    %c0_i32_0 = arith.constant 0 : i32
    %c0_i32_1 = arith.constant 0 : i32
    return %c0_i32, %c0_i32_0 : i32, i32
  }
  func.func @transform_16(%arg0: i32, %arg1: i32) -> (i32, i32) {
    %c0_i32 = arith.constant 0 : i32
    %c0_i32_0 = arith.constant 0 : i32
    %c0_i32_1 = arith.constant 0 : i32
    return %c0_i32, %c0_i32_0 : i32, i32
  }
  func.func @transform_17(%arg0: i32, %arg1: i32) -> (i32, i32) {
    %c0_i32 = arith.constant 0 : i32
    %c0_i32_0 = arith.constant 0 : i32
    %c0_i32_1 = arith.constant 0 : i32
    return %c0_i32, %c0_i32_0 : i32, i32
  }
  func.func @transform_18(%arg0: i32, %arg1: i32) -> (i32, i32, i32) {
    %c0_i32 = arith.constant 0 : i32
    %c0_i32_0 = arith.constant 0 : i32
    %c0_i32_1 = arith.constant 0 : i32
    return %arg0, %c0_i32, %c0_i32_0 : i32, i32, i32
  }
}

</mosaic_0001>

<bundles_post_ra>
// kernel: tpu_custom_call.1
= control target key start
LH: loop header
LB: loop body
LE: loop exit
PB: predicated region body
PF: predicated region fallthrough
CT: control target
= control target key end

     0   :  { %s5244_s0 = inlined_call_operand.hbm [shape: f32[2,12,64], index: 0, kind: input, shape index: {}]   ;;  %s5245_s1 = inlined_call_operand.hbm [shape: f32[1,64], index: 1, kind: input, shape index: {}]   ;;  %s5246_s2 = inlined_call_operand.hbm [shape: f32[1,64], index: 2, kind: input, shape index: {}]   ;;  %s5247_s3 = inlined_call_operand.hbm [shape: f32[2,1,64], index: 3, kind: input, shape index: {}]   ;;  %s5248_s4 = inlined_call_operand.hbm [shape: f32[2,1,64], index: 4, kind: input, shape index: {}]   ;;  %s5249_s5 = inlined_call_operand.hbm [shape: bf16[2,64,192], index: 5, kind: input, shape index: {}]   ;;  %s5250_s6 = inlined_call_operand.hbm [shape: f32[2,1,192], index: 6, kind: input, shape index: {}]   ;;  %s5251_s7 = inlined_call_operand.hbm [shape: bf16[2,64,64], index: 7, kind: input, shape index: {}]   ;;  %s5252_s8 = inlined_call_operand.hbm [shape: f32[2,1,64], index: 8, kind: input, shape index: {}]   ;;  %s5253_s9 = inlined_call_operand.hbm [shape: f32[2,1,64], index: 9, kind: input, shape index: {}]   ;;  %s5254_s10 = inlined_call_operand.hbm [shape: f32[2,1,64], index: 10, kind: input, shape index: {}]   ;;  %s5255_s11 = inlined_call_operand.hbm [shape: bf16[2,64,256], index: 11, kind: input, shape index: {}]   ;;  %s5256_s12 = inlined_call_operand.hbm [shape: f32[2,1,256], index: 12, kind: input, shape index: {}]   ;;  %s5257_s13 = inlined_call_operand.hbm [shape: bf16[2,256,64], index: 13, kind: input, shape index: {}]   ;;  %s5258_s14 = inlined_call_operand.hbm [shape: f32[2,1,64], index: 14, kind: input, shape index: {}]   ;;  %s5259_s15 = inlined_call_operand.hbm [shape: f32[1,64], index: 15, kind: input, shape index: {}]   ;;  %s5260_s16 = inlined_call_operand.hbm [shape: f32[1,64], index: 16, kind: input, shape index: {}]   ;;  %s5261_s17 = inlined_call_operand.hbm [shape: bf16[64,32], index: 17, kind: input, shape index: {}]   ;;  %s5262_s18 = inlined_call_operand.hbm [shape: f32[2,4,32], index: 18, kind: output, shape index: {}]  }
   0x1   :  { %5324 = sst [smem:[#allocation56_spill]] %s5244_s0 }
   0x2   :  { %5325 = sst [smem:[#allocation57_spill]] %s5245_s1 }
   0x3   :  { %5326 = sst [smem:[#allocation58_spill]] %s5246_s2 }
   0x4   :  { %5327 = sst [smem:[#allocation59_spill]] %s5247_s3 }
   0x5   :  { %5328 = sst [smem:[#allocation60_spill]] %s5248_s4 }
   0x6   :  { %5329 = sst [smem:[#allocation61_spill]] %s5249_s5 }
   0x7   :  { %5330 = sst [smem:[#allocation62_spill]] %s5250_s6 }
   0x8   :  { %5331 = sst [smem:[#allocation63_spill]] %s5251_s7 }
   0x9   :  { %5332 = sst [smem:[#allocation64_spill]] %s5252_s8 }
   0xa   :  { %5333 = sst [smem:[#allocation65_spill]] %s5253_s9 }
   0xb   :  { %5334 = sst [smem:[#allocation66_spill]] %s5254_s10 }
   0xc   :  { %5335 = sst [smem:[#allocation67_spill]] %s5255_s11 }
   0xd   :  { %5336 = sst [smem:[#allocation68_spill]] %s5256_s12 }
   0xe   :  { %5337 = sst [smem:[#allocation69_spill]] %s5257_s13 }
   0xf   :  { %5338 = sst [smem:[#allocation70_spill]] %s5258_s14 }
  0x10   :  { %5339 = sst [smem:[#allocation71_spill]] %s5259_s15 }
  0x11   :  { %5340 = sst [smem:[#allocation72_spill]] %s5260_s16 }
  0x12   :  { %5341 = sst [smem:[#allocation73_spill]] %s5261_s17 }
  0x13   :  { %5342 = sst [smem:[#allocation74_spill]] %s5262_s18 }
  0x14   :  { %23 = vsyncpa [#allocation5], 0 }
  0x15   :  { %25 = vsyncpa [#allocation5 + $0x1], 0 }
  0x16   :  { %26 = vsyncpa [#allocation8], 0 }
  0x17   :  { %27 = vsyncpa [#allocation11], 0 }
  0x18   :  { %29 = vsyncpa [#allocation11 + $0x1], 0 }
  0x19   :  { %30 = vsyncpa [#allocation14], 0 }
  0x1a   :  { %32 = vsyncpa [#allocation14 + $0x1], 0 }
  0x1b   :  { %33 = vsyncpa [#allocation17], 0 }
  0x1c   :  { %35 = vsyncpa [#allocation17 + $0x1], 0 }
  0x1d   :  { %36 = vsyncpa [#allocation20], 0 }
  0x1e   :  { %38 = vsyncpa [#allocation20 + $0x1], 0 }
  0x1f   :  { %39 = vsyncpa [#allocation23], 0 }
  0x20   :  { %41 = vsyncpa [#allocation23 + $0x1], 0 }
  0x21   :  { %42 = vsyncpa [#allocation26], 0 }
  0x22   :  { %44 = vsyncpa [#allocation26 + $0x1], 0 }
  0x23   :  { %45 = vsyncpa [#allocation29], 0 }
  0x24   :  { %46 = vsyncpa [#allocation32], 0 }
  0x25   :  { %47 = vsyncpa [#allocation6], 0 }
  0x26   :  { %49 = vsyncpa [#allocation6 + $0x1], 0  ;;  %s4199_s27 = smov 0   ;;  %s4201_s28 = smov 0  }
  0x27   :  { %s4203_s29 = smov 0   ;;  %s4205_s30 = smov 0  }
  0x28   :  { %s4207_s0 = smov 0   ;;  %s4209_s19 = smov 0  }
  0x29   :  { %s4211_s1 = smov 0   ;;  %s4213_s20 = smov 0  }
  0x2a   :  { %s4215_s21 = smov 0   ;;  %s4217_s22 = smov 0  }
  0x2b   :  { %s4219_s2 = smov 0  }
  0x2c LB: > { %5343 = sst [smem:[#allocation45_spill]] %s4031_s28  ;;  %s4253_s23 = sadd.s32 4294967295, %s4067_s2   ;;  %s4067_s2 = sphi %s4219_s2, %s55_s2   ;;  %s4063_s22 = sphi %s4217_s22, %s5455_s22   ;;  %s4059_s21 = sphi %s4215_s21, %s5454_s21   ;;  %s4055_s20 = sphi %s4213_s20, %s5453_s20   ;;  %s4051_s1 = sphi %s4211_s1, %s5452_s1   ;;  %s4047_s19 = sphi %s4209_s19, %s5451_s19   ;;  %s4043_s0 = sphi %s4207_s0, %s5450_s0   ;;  %s4039_s30 = sphi %s4205_s30, %s5449_s30   ;;  %s4035_s29 = sphi %s4203_s29, %s5448_s29   ;;  %s4031_s28 = sphi %s4201_s28, %s5445_s28   ;;  %s4027_s27 = sphi %s4199_s27, %s5444_s27  }
  0x2d   : > { %5344 = sst [smem:[#allocation46_spill]] %s4035_s29  ;;  %p5278_p0 = scmp.eq.s32.totalorder %s4067_s2, 0 }
  0x2e   : > { %5345 = sst [smem:[#allocation47_spill]] %s4039_s30  ;;  %p5277_p1 = scmp.eq.s32.totalorder %s4253_s23, 0 }
  0x2f   : > { %5346 = sst [smem:[#allocation48_spill]] %s4043_s0  ;;  %p149_p2 = scmp.ne.s32.totalorder %s4035_s29, %s4031_s28 }
  0x30   : > { %5347 = sst [smem:[#allocation49_spill]] %s4051_s1  ;;  %p155_p3 = scmp.ne.s32.totalorder %s4031_s28, %s4027_s27 }
  0x31   : > { %5348 = sst [smem:[#allocation50_spill]] %s4055_s20  ;;  %p2793_p4 = scmp.ge.s32.totalorder %s4067_s2, 1 }
  0x32   : > { %5349 = sst [smem:[#allocation51_spill]] %s4253_s23  ;;  %p151_p5 = por %p149_p2, %p5278_p0 }
  0x33   : > { %p541_p6 = scmp.lt.s32.totalorder %s4067_s2, 5  ;;  %p4266_p7 = por %p155_p3, %p5277_p1 }
  0x34   : > { %s4069_s26 = smov [#allocation7]   ;;  %p5276_p10 = scmp.lt.s32.totalorder %s4067_s2, 4 }
  0x35   : > { %s5350_s24 = scalar_select %p4266_p7, 1, 0 }
  0x36   : > { %p4270_p8 = pnand %p2793_p4, %p541_p6  ;;  %s554_s18 = sshll.u32 %s4069_s26, 4  ;;  %s555_s18 = int_to_ptr.vmem [resolvable:$true] %s554_s18 }
  0x37   : > { %5351 = sst [smem:[#allocation52_spill]] %s5350_s24  ;;  %s4070_s20 = smov [#allocation28]  }
  0x38   : > { %s5352_s25 = scalar_select %p4270_p8, 1, 0 }
  0x39   : > { %p3088_p9 = pneg %p4270_p8  ;;  %s576_s1 = sshll.u32 %s4070_s20, 4  ;;  %s4289_s1 = int_to_ptr.vmem [resolvable:$true] %s576_s1 }
  0x3a   : > { %5353 = sst [smem:[#allocation53_spill]] %s5352_s25  ;;  %p4285_p12 = pnand %p5276_p10, %p151_p5 }
  0x3b   : > { %p4279_p11 = pnand %p3088_p9, %p5277_p1  ;;  %s5356_s25 = sld [smem:[#allocation57_spill]] }
  0x3c   : > { %s5355_s24 = scalar_select %p4285_p12, 1, 0 }
  0x3d   : > { %s5354_s27 = scalar_select %p4279_p11, 1, 0 }
  0x3e   : > { %p4299_p2 = pneg %p4279_p11 }
  0x40   : > { %s5357_s8 = scalar_select %p4299_p2, 1, 0 }
  0x41   : > { %s3379_s14 = scalar_lea.hbm %s5356_s25, 16 }
  0x42   : > { %p3380_p13 = scmp.ne.s32.totalorder %s5356_s25, %s3379_s14  ;;  %p3386_p5 = scmp.lt.u32.totalorder %s3379_s14, %s5356_s25 }
  0x44   : > { %p3382_p3 = pnand %p4299_p2, %p3380_p13 }
  0x46   : > { %p3383_p4 = pneg %p3382_p3 }
  0x48   : > { %p3388_p6 = pnand %p3386_p5, %p3383_p4 }
  0x4a   : > { %3391 = shalt.err (!%p3388_p6)
}
  0x4b   : > { %s3392_s28 = scalar_lea.vmem %s555_s18, 16  ;;  %s3399_s10 = scalar_lea.vmem %s555_s18, 32 }
  0x4c   : > { %p3393_p9 = scmp.ne.s32.totalorder %s555_s18, %s3392_s28  ;;  %p3400_p0 = scmp.lt.s32.totalorder %s555_s18, %s555_s18 }
  0x4d   : > { %p3401_p7 = scmp.lt.s32.totalorder %s3399_s10, %s3392_s28 }
  0x4e   : > { %p3395_p10 = pnand %p3393_p9, %p4299_p2 }
  0x4f   : > { %p3402_p8 = por %p3401_p7, %p3400_p0 }
  0x50   : > { %p3396_p1 = pneg %p3395_p10 }
  0x52   : > { %p3403_p12 = pnand %p3402_p8, %p3396_p1 }
  0x54   : > { %3406 = shalt.err (!%p3403_p12)
}
  0x55   : > { %3091 = dma.hbm_to_vmem [thread:$0]  (!%p4279_p11), %s5356_s25, 16, %s555_s18, [#allocation8]  }
  0x56   : > { %s5358_s15 = sld [smem:[#allocation71_spill]] }
  0x5c   : > { %s3407_s20 = scalar_lea.hbm %s5358_s15, 16 }
  0x5d   : > { %p3408_p10 = scmp.ne.s32.totalorder %s5358_s15, %s3407_s20  ;;  %p3414_p1 = scmp.lt.u32.totalorder %s3407_s20, %s5358_s15 }
  0x5f   : > { %p3410_p13 = pnand %p3408_p10, %p4299_p2 }
  0x61   : > { %p3411_p0 = pneg %p3410_p13 }
  0x63   : > { %p3416_p7 = pnand %p3414_p1, %p3411_p0 }
  0x65   : > { %3419 = shalt.err (!%p3416_p7)
}
  0x66   : > { %s3420_s18 = scalar_lea.vmem %s4289_s1, 16  ;;  %s3427_s4 = scalar_lea.vmem %s4289_s1, 32 }
  0x67   : > { %p3421_p8 = scmp.ne.s32.totalorder %s4289_s1, %s3420_s18  ;;  %p3428_p4 = scmp.lt.s32.totalorder %s4289_s1, %s4289_s1 }
  0x68   : > { %p3429_p5 = scmp.lt.s32.totalorder %s3427_s4, %s3420_s18 }
  0x69   : > { %p3423_p12 = pnand %p3421_p8, %p4299_p2 }
  0x6a   : > { %p3430_p6 = por %p3429_p5, %p3428_p4 }
  0x6b   : > { %p3424_p3 = pneg %p3423_p12 }
  0x6d   : > { %p3431_p9 = pnand %p3430_p6, %p3424_p3 }
  0x6f   : > { %3434 = shalt.err (!%p3431_p9)
}
  0x70   : > { %3097 = dma.hbm_to_vmem [thread:$0]  (!%p4279_p11), %s5358_s15, 16, %s4289_s1, [#allocation29]  }
  0x71   : > { %s4340_s26 = sand.u32 1, %s4067_s2   ;;  %s4343_s6 = sand.u32 1, %s4035_s29  }
  0x72   : > { %5359 = sst [smem:[#allocation54_spill]] %s4340_s26  ;;  %s4346_s14 = sshll.u32 %s4059_s21, 4 }
  0x73   : > { %s635_s20 = scalar_lea.vmem [#allocation10], %s4343_s6  ;;  %s5360_s3 = sld [smem:[#allocation59_spill]] }
  0x74   : > { %s642_s28 = sshll.u32 %s635_s20, 4  ;;  %p5361_p13 = scmp.ne.s32.totalorder %s5355_s24, 0  ;;  %s4355_s28 = int_to_ptr.vmem [resolvable:$true] %s642_s28 }
  0x76   : > { %p4362_p0 = pneg %p5361_p13 }
  0x78   : > { %s5362_s12 = scalar_select %p4362_p0, 1, 0 }
  0x79   : > { %s4353_s4 = scalar_lea.hbm %s5360_s3, %s4346_s14  ;;  %s3440_s18 = scalar_lea.hbm %s5360_s3, 32 }
  0x7a   : > { %s3435_s23 = scalar_lea.hbm %s4353_s4, 16  ;;  %p3441_p8 = scmp.lt.u32.totalorder %s4353_s4, %s5360_s3 }
  0x7b   : > { %p3436_p10 = scmp.ne.s32.totalorder %s4353_s4, %s3435_s23  ;;  %p3442_p12 = scmp.lt.u32.totalorder %s3440_s18, %s3435_s23 }
  0x7c   : > { %p3444_p4 = scmp.lt.u32.totalorder %s3435_s23, %s4353_s4 }
  0x7d   : > { %p3438_p1 = pnand %p4362_p0, %p3436_p10  ;;  %p3443_p3 = por %p3442_p12, %p3441_p8 }
  0x7f   : > { %p3439_p7 = pneg %p3438_p1  ;;  %p3445_p5 = por %p3444_p4, %p3443_p3 }
  0x81   : > { %p3446_p6 = pnand %p3445_p5, %p3439_p7 }
  0x83   : > { %3449 = shalt.err (!%p3446_p6)
}
  0x84   : > { %s3450_s1 = scalar_lea.vmem %s4355_s28, 16  ;;  %s4071_s20 = smov [#allocation10]  }
  0x85   : > { %p3451_p9 = scmp.ne.s32.totalorder %s4355_s28, %s3450_s1  ;;  %s3455_s10 = sshll.u32 %s4071_s20, 4  ;;  %s3456_s10 = int_to_ptr.vmem [resolvable:$false] %s3455_s10 }
  0x86   : > { %s3457_s15 = scalar_lea.vmem %s3456_s10, 32  ;;  %p3458_p11 = scmp.lt.s32.totalorder %s4355_s28, %s3456_s10 }
  0x87   : > { %p3453_p10 = pnand %p3451_p9, %p4362_p0  ;;  %p3459_p2 = scmp.lt.s32.totalorder %s3457_s15, %s3450_s1 }
  0x89   : > { %p3454_p1 = pneg %p3453_p10  ;;  %p3460_p8 = por %p3459_p2, %p3458_p11 }
  0x8b   : > { %p3461_p12 = pnand %p3460_p8, %p3454_p1 }
  0x8d   : > { %3464 = shalt.err (!%p3461_p12)
}
  0x8e   : > { %s5363_s25 = scalar_lea.sflag [#allocation11], %s4340_s26  ;;  %s5294_s23 = sshll.u32 %s4343_s6, 6 }
  0x8f   : > { %3110 = dma.hbm_to_vmem [thread:$0]  (!%p5361_p13), %s4353_s4, 16, %s4355_s28, %s5363_s25  }
  0x90   : > { %s5295_s18 = sshll.u32 %s4059_s21, 10  ;;  %s5364_s5 = sld [smem:[#allocation61_spill]] }
  0x91   : > { %s670_s15 = scalar_lea.vmem [#allocation13], %s5294_s23  ;;  %s5297_s29 = scalar_lea.sflag [#allocation14], %s4340_s26 }
  0x92   : > { %s677_s3 = sshll.u32 %s670_s15, 4  ;;  %s4398_s3 = int_to_ptr.vmem [resolvable:$true] %s677_s3 }
  0x96   : > { %s4394_s10 = scalar_lea.hbm %s5364_s5, %s5295_s18  ;;  %s3470_s25 = scalar_lea.hbm %s5364_s5, 2048 }
  0x97   : > { %s3465_s30 = scalar_lea.hbm %s4394_s10, 1024  ;;  %p3471_p3 = scmp.lt.u32.totalorder %s4394_s10, %s5364_s5 }
  0x98   : > { %p3466_p11 = scmp.ne.s32.totalorder %s4394_s10, %s3465_s30  ;;  %p3472_p4 = scmp.lt.u32.totalorder %s3470_s25, %s3465_s30 }
  0x99   : > { %p3474_p6 = scmp.lt.u32.totalorder %s3465_s30, %s4394_s10 }
  0x9a   : > { %p3468_p2 = pnand %p3466_p11, %p4362_p0  ;;  %p3473_p5 = por %p3472_p4, %p3471_p3 }
  0x9c   : > { %p3469_p7 = pneg %p3468_p2  ;;  %p3475_p9 = por %p3474_p6, %p3473_p5 }
  0x9e   : > { %p3476_p10 = pnand %p3475_p9, %p3469_p7 }
  0xa0   : > { %3479 = shalt.err (!%p3476_p10)
}
  0xa1   : > { %s3480_s15 = scalar_lea.vmem %s4398_s3, 1024  ;;  %s4072_s28 = smov [#allocation13]  }
  0xa2   : > { %p3481_p1 = scmp.ne.s32.totalorder %s4398_s3, %s3480_s15  ;;  %s3485_s4 = sshll.u32 %s4072_s28, 4  ;;  %s3486_s4 = int_to_ptr.vmem [resolvable:$false] %s3485_s4 }
  0xa3   : > { %s3487_s1 = scalar_lea.vmem %s3486_s4, 2048  ;;  %p3488_p11 = scmp.lt.s32.totalorder %s4398_s3, %s3486_s4 }
  0xa4   : > { %p3483_p8 = pnand %p3481_p1, %p4362_p0  ;;  %p3489_p2 = scmp.lt.s32.totalorder %s3487_s1, %s3480_s15 }
  0xa6   : > { %p3484_p12 = pneg %p3483_p8  ;;  %p3490_p3 = por %p3489_p2, %p3488_p11 }
  0xa8   : > { %p3491_p4 = pnand %p3490_p3, %p3484_p12 }
  0xaa   : > { %3494 = shalt.err (!%p3491_p4)
}
  0xab   : > { %s5298_s30 = smov 128   ;;  %s5308_s25 = smov 8  }
  0xac   : > { %3116 = dma.hbm_to_vmem [thread:$0]  (!%p5361_p13), %s4394_s10, 1024, %s4398_s3, %s5297_s29, %s5298_s30, %s5298_s30, %s5308_s25  }
  0xad   : > { %s2811_s20 = sshll.u32 %s4343_s6, 5  ;;  %s2916_s15 = sshll.u32 %s4059_s21, 9 }
  0xae   : > { %s5365_s7 = sld [smem:[#allocation63_spill]]  ;;  %s710_s23 = scalar_lea.vmem [#allocation16], %s2811_s20 }
  0xaf   : > { %s717_s18 = sshll.u32 %s710_s23, 4  ;;  %s5300_s5 = scalar_lea.sflag [#allocation17], %s4340_s26  ;;  %s4434_s18 = int_to_ptr.vmem [resolvable:$true] %s717_s18 }
  0xb4   : > { %s4432_s1 = scalar_lea.hbm %s5365_s7, %s2916_s15  ;;  %s3500_s28 = scalar_lea.hbm %s5365_s7, 1024 }
  0xb5   : > { %s3495_s0 = scalar_lea.hbm %s4432_s1, 512  ;;  %p3501_p9 = scmp.lt.u32.totalorder %s4432_s1, %s5365_s7 }
  0xb6   : > { %p3496_p7 = scmp.ne.s32.totalorder %s4432_s1, %s3495_s0  ;;  %p3502_p10 = scmp.lt.u32.totalorder %s3500_s28, %s3495_s0 }
  0xb7   : > { %p3504_p8 = scmp.lt.u32.totalorder %s3495_s0, %s4432_s1 }
  0xb8   : > { %p3498_p5 = pnand %p3496_p7, %p4362_p0  ;;  %p3503_p1 = por %p3502_p10, %p3501_p9 }
  0xba   : > { %p3499_p6 = pneg %p3498_p5  ;;  %p3505_p12 = por %p3504_p8, %p3503_p1 }
  0xbc   : > { %p3506_p11 = pnand %p3505_p12, %p3499_p6 }
  0xbe   : > { %3509 = shalt.err (!%p3506_p11)
}
  0xbf   : > { %s3510_s23 = scalar_lea.vmem %s4434_s18, 512  ;;  %s4075_s20 = smov [#allocation16]  }
  0xc0   : > { %p3511_p2 = scmp.ne.s32.totalorder %s4434_s18, %s3510_s23  ;;  %s3515_s3 = sshll.u32 %s4075_s20, 4  ;;  %s3516_s3 = int_to_ptr.vmem [resolvable:$false] %s3515_s3 }
  0xc1   : > { %s3517_s10 = scalar_lea.vmem %s3516_s3, 1024  ;;  %p3518_p7 = scmp.lt.s32.totalorder %s4434_s18, %s3516_s3 }
  0xc2   : > { %p3513_p3 = pnand %p3511_p2, %p4362_p0  ;;  %p3519_p5 = scmp.lt.s32.totalorder %s3517_s10, %s3510_s23 }
  0xc4   : > { %p3514_p4 = pneg %p3513_p3  ;;  %p3520_p9 = por %p3519_p5, %p3518_p7 }
  0xc6   : > { %p3521_p10 = pnand %p3520_p9, %p3514_p4 }
  0xc8   : > { %3524 = shalt.err (!%p3521_p10)
}
  0xc9   : > { %s5301_s0 = smov 64   ;;  %s5304_s28 = smov 4  }
  0xca   : > { %3122 = dma.hbm_to_vmem [thread:$0]  (!%p5361_p13), %s4432_s1, 512, %s4434_s18, %s5300_s5, %s5301_s0, %s5301_s0, %s5304_s28  }
  0xcb   : > { %s5366_s9 = sld [smem:[#allocation65_spill]]  ;;  %s747_s20 = scalar_lea.vmem [#allocation19], %s4343_s6 }
  0xcc   : > { %s754_s3 = sshll.u32 %s747_s20, 4  ;;  %s5306_s10 = scalar_lea.sflag [#allocation20], %s4340_s26  ;;  %s755_s3 = int_to_ptr.vmem [resolvable:$true] %s754_s3 }
  0xd1   : > { %s4467_s23 = scalar_lea.hbm %s5366_s9, %s4346_s14  ;;  %s3530_s1 = scalar_lea.hbm %s5366_s9, 32 }
  0xd2   : > { %s3525_s29 = scalar_lea.hbm %s4467_s23, 16  ;;  %p3531_p12 = scmp.lt.u32.totalorder %s4467_s23, %s5366_s9 }
  0xd3   : > { %p3526_p6 = scmp.ne.s32.totalorder %s4467_s23, %s3525_s29  ;;  %p3532_p11 = scmp.lt.u32.totalorder %s3530_s1, %s3525_s29 }
  0xd4   : > { %p3534_p3 = scmp.lt.u32.totalorder %s3525_s29, %s4467_s23 }
  0xd5   : > { %p3528_p1 = pnand %p3526_p6, %p4362_p0  ;;  %p3533_p2 = por %p3532_p11, %p3531_p12 }
  0xd7   : > { %p3529_p8 = pneg %p3528_p1  ;;  %p3535_p4 = por %p3534_p3, %p3533_p2 }
  0xd9   : > { %p3536_p7 = pnand %p3535_p4, %p3529_p8 }
  0xdb   : > { %3539 = shalt.err (!%p3536_p7)
}
  0xdc   : > { %s3540_s20 = scalar_lea.vmem %s755_s3, 16  ;;  %s4078_s5 = smov [#allocation19]  }
  0xdd   : > { %p3541_p5 = scmp.ne.s32.totalorder %s755_s3, %s3540_s20  ;;  %s3545_s0 = sshll.u32 %s4078_s5, 4  ;;  %s3546_s0 = int_to_ptr.vmem [resolvable:$false] %s3545_s0 }
  0xde   : > { %s3547_s30 = scalar_lea.vmem %s3546_s0, 32  ;;  %p3548_p6 = scmp.lt.s32.totalorder %s755_s3, %s3546_s0 }
  0xdf   : > { %p3543_p9 = pnand %p3541_p5, %p4362_p0  ;;  %p3549_p1 = scmp.lt.s32.totalorder %s3547_s30, %s3540_s20 }
  0xe1   : > { %p3544_p10 = pneg %p3543_p9  ;;  %p3550_p13 = por %p3549_p1, %p3548_p6 }
  0xe3   : > { %p3551_p11 = pnand %p3550_p13, %p3544_p10 }
  0xe5   : > { %3554 = shalt.err (!%p3551_p11)
}
  0xe6   : > { %p5367_p12 = scmp.ne.s32.totalorder %s5355_s24, 0  ;;  %s5368_s29 = sshll.u32 %s4059_s21, 10 }
  0xe7   : > { %s5369_s11 = sld [smem:[#allocation67_spill]]  ;;  %s5370_s1 = sshll.u32 %s4343_s6, 6 }
  0xe8   : > { %3128 = dma.hbm_to_vmem [thread:$0]  (!%p5367_p12), %s4467_s23, 16, %s755_s3, %s5306_s10  }
  0xe9   : > { %s782_s15 = scalar_lea.vmem [#allocation22], %s5370_s1  ;;  %s2823_s20 = sshll.u32 %s4343_s6, 7 }
  0xea   : > { %s789_s4 = sshll.u32 %s782_s15, 4  ;;  %s5307_s30 = scalar_lea.sflag [#allocation23], %s4340_s26  ;;  %s4499_s4 = int_to_ptr.vmem [resolvable:$true] %s789_s4 }
  0xed   : > { %s4495_s0 = scalar_lea.hbm %s5369_s11, %s5368_s29  ;;  %s3560_s29 = scalar_lea.hbm %s5369_s11, 2048 }
  0xee   : > { %s3555_s28 = scalar_lea.hbm %s4495_s0, 1024  ;;  %p3561_p3 = scmp.lt.u32.totalorder %s4495_s0, %s5369_s11 }
  0xef   : > { %p3556_p13 = scmp.ne.s32.totalorder %s4495_s0, %s3555_s28  ;;  %p3562_p4 = scmp.lt.u32.totalorder %s3560_s29, %s3555_s28 }
  0xf0   : > { %p3564_p5 = scmp.lt.u32.totalorder %s3555_s28, %s4495_s0 }
  0xf1   : > { %p3558_p8 = pnand %p3556_p13, %p4362_p0  ;;  %p3563_p7 = por %p3562_p4, %p3561_p3 }
  0xf3   : > { %p3559_p2 = pneg %p3558_p8  ;;  %p3565_p9 = por %p3564_p5, %p3563_p7 }
  0xf5   : > { %p3566_p10 = pnand %p3565_p9, %p3559_p2 }
  0xf7   : > { %3569 = shalt.err (!%p3566_p10)
}
  0xf8   : > { %s3570_s1 = scalar_lea.vmem %s4499_s4, 1024  ;;  %s4079_s15 = smov [#allocation22]  }
  0xf9   : > { %p3571_p6 = scmp.ne.s32.totalorder %s4499_s4, %s3570_s1  ;;  %s3575_s23 = sshll.u32 %s4079_s15, 4  ;;  %s3576_s23 = int_to_ptr.vmem [resolvable:$false] %s3575_s23 }
  0xfa   : > { %s3577_s3 = scalar_lea.vmem %s3576_s23, 2048  ;;  %p3578_p13 = scmp.lt.s32.totalorder %s4499_s4, %s3576_s23 }
  0xfb   : > { %p3573_p1 = pnand %p3571_p6, %p4362_p0  ;;  %p3579_p8 = scmp.lt.s32.totalorder %s3577_s3, %s3570_s1 }
  0xfd   : > { %p3574_p11 = pneg %p3573_p1  ;;  %p3580_p3 = por %p3579_p8, %p3578_p13 }
  0xff   : > { %p3581_p4 = pnand %p3580_p3, %p3574_p11 }
 0x101   : > { %3584 = shalt.err (!%p3581_p4)
}
 0x102   : > { %s5371_s28 = smov 128   ;;  %s2919_s29 = sshll.u32 %s4059_s21, 11 }
 0x103   : > { %3134 = dma.hbm_to_vmem [thread:$0]  (!%p5367_p12), %s4495_s0, 1024, %s4499_s4, %s5307_s30, %s5371_s28, %s5371_s28, %s5308_s25  }
 0x104   : > { %s5372_s13 = sld [smem:[#allocation69_spill]]  ;;  %s822_s15 = scalar_lea.vmem [#allocation25], %s2823_s20 }
 0x105   : > { %s829_s23 = sshll.u32 %s822_s15, 4  ;;  %s5314_s3 = scalar_lea.sflag [#allocation26], %s4340_s26  ;;  %s4537_s23 = int_to_ptr.vmem [resolvable:$true] %s829_s23 }
 0x10a   : > { %s4533_s1 = scalar_lea.hbm %s5372_s13, %s2919_s29  ;;  %s3590_s29 = scalar_lea.hbm %s5372_s13, 4096 }
 0x10b   : > { %s3585_s10 = scalar_lea.hbm %s4533_s1, 2048  ;;  %p3591_p9 = scmp.lt.u32.totalorder %s4533_s1, %s5372_s13 }
 0x10c   : > { %p3586_p2 = scmp.ne.s32.totalorder %s4533_s1, %s3585_s10  ;;  %p3592_p10 = scmp.lt.u32.totalorder %s3590_s29, %s3585_s10 }
 0x10d   : > { %p3594_p1 = scmp.lt.u32.totalorder %s3585_s10, %s4533_s1 }
 0x10e   : > { %p3588_p7 = pnand %p3586_p2, %p4362_p0  ;;  %p3593_p6 = por %p3592_p10, %p3591_p9 }
 0x110   : > { %p3589_p5 = pneg %p3588_p7  ;;  %p3595_p11 = por %p3594_p1, %p3593_p6 }
 0x112   : > { %p3596_p13 = pnand %p3595_p11, %p3589_p5 }
 0x114   : > { %3599 = shalt.err (!%p3596_p13)
}
 0x115   : > { %s3600_s20 = scalar_lea.vmem %s4537_s23, 2048  ;;  %s4080_s15 = smov [#allocation25]  }
 0x116   : > { %p3601_p8 = scmp.ne.s32.totalorder %s4537_s23, %s3600_s20  ;;  %s3605_s0 = sshll.u32 %s4080_s15, 4  ;;  %s3606_s0 = int_to_ptr.vmem [resolvable:$false] %s3605_s0 }
 0x117   : > { %s3607_s4 = scalar_lea.vmem %s3606_s0, 4096  ;;  %p3608_p2 = scmp.lt.s32.totalorder %s4537_s23, %s3606_s0 }
 0x118   : > { %p3603_p3 = pnand %p3601_p8, %p4362_p0  ;;  %p3609_p7 = scmp.lt.s32.totalorder %s3607_s4, %s3600_s20 }
 0x11a   : > { %p3604_p4 = pneg %p3603_p3  ;;  %p3610_p9 = por %p3609_p7, %p3608_p2 }
 0x11c   : > { %p3611_p10 = pnand %p3610_p9, %p3604_p4 }
 0x11e   : > { %3614 = shalt.err (!%p3611_p10)
}
 0x11f   : > { %s5373_s10 = smov 4   ;;  %s5374_s29 = smov 64  }
 0x120   : > { %3140 = dma.hbm_to_vmem [thread:$0]  (!%p5367_p12), %s4533_s1, 2048, %s4537_s23, %s5314_s3, %s5374_s29, %s5374_s29, %s5373_s10  }
 0x121   : > { %s4081_s5 = smov [#allocation9]   ;;  %s4082_s15 = smov [#allocation30]  }
 0x122   : > { %s565_s18 = sshll.u32 %s4081_s5, 4  ;;  %s587_s0 = sshll.u32 %s4082_s15, 4  ;;  %s566_s18 = int_to_ptr.vmem [resolvable:$true] %s565_s18  ;;  %s588_s0 = int_to_ptr.vmem [resolvable:$true] %s587_s0 }
 0x123   : > { %s5375_s30 = sld [smem:[#allocation58_spill]]  ;;  %p5377_p6 = scmp.ne.s32.totalorder %s5357_s8, 0 }
 0x129   : > { %s5376_s25 = smov %s5375_s30  ;;  %s3615_s7 = scalar_lea.hbm %s5375_s30, 16 }
 0x12a   : > { %p3616_p5 = scmp.ne.s32.totalorder %s5376_s25, %s3615_s7  ;;  %p3622_p13 = scmp.lt.u32.totalorder %s3615_s7, %s5376_s25 }
 0x12c   : > { %p3618_p1 = pnand %p3616_p5, %p5377_p6 }
 0x12e   : > { %p3619_p11 = pneg %p3618_p1 }
 0x130   : > { %p3624_p8 = pnand %p3622_p13, %p3619_p11 }
 0x132   : > { %3627 = shalt.err (!%p3624_p8)
}
 0x133   : > { %s3628_s1 = scalar_lea.vmem %s566_s18, 16  ;;  %s3635_s30 = scalar_lea.vmem %s566_s18, 32 }
 0x134   : > { %p3629_p3 = scmp.ne.s32.totalorder %s566_s18, %s3628_s1  ;;  %p3636_p7 = scmp.lt.s32.totalorder %s566_s18, %s566_s18 }
 0x135   : > { %p3637_p9 = scmp.lt.s32.totalorder %s3635_s30, %s3628_s1 }
 0x136   : > { %p3631_p4 = pnand %p3629_p3, %p5377_p6 }
 0x137   : > { %p3638_p10 = por %p3637_p9, %p3636_p7 }
 0x138   : > { %p3632_p2 = pneg %p3631_p4 }
 0x13a   : > { %p3639_p12 = pnand %p3638_p10, %p3632_p2 }
 0x13c   : > { %3642 = shalt.err (!%p3639_p12)
}
 0x13d   : > { %p5378_p5 = scmp.ne.s32.totalorder %s5354_s27, 0  ;;  %s5379_s16 = sld [smem:[#allocation72_spill]] }
 0x13f   : > { %3094 = dma.hbm_to_vmem [thread:$0]  (!%p5378_p5), %s5376_s25, 16, %s566_s18, [#allocation8]  }
 0x143   : > { %s3643_s26 = scalar_lea.hbm %s5379_s16, 16 }
 0x144   : > { %p3644_p1 = scmp.ne.s32.totalorder %s5379_s16, %s3643_s26  ;;  %p3650_p12 = scmp.lt.u32.totalorder %s3643_s26, %s5379_s16 }
 0x146   : > { %p3646_p11 = pnand %p3644_p1, %p5377_p6 }
 0x148   : > { %p3647_p13 = pneg %p3646_p11 }
 0x14a   : > { %p3652_p8 = pnand %p3650_p12, %p3647_p13 }
 0x14c   : > { %3655 = shalt.err (!%p3652_p8)
}
 0x14d   : > { %s3656_s4 = scalar_lea.vmem %s588_s0, 16  ;;  %s3663_s18 = scalar_lea.vmem %s588_s0, 32 }
 0x14e   : > { %p3657_p3 = scmp.ne.s32.totalorder %s588_s0, %s3656_s4  ;;  %p3664_p7 = scmp.lt.s32.totalorder %s588_s0, %s588_s0 }
 0x14f   : > { %p3665_p9 = scmp.lt.s32.totalorder %s3663_s18, %s3656_s4 }
 0x150   : > { %p3659_p4 = pnand %p3657_p3, %p5377_p6 }
 0x151   : > { %p3666_p10 = por %p3665_p9, %p3664_p7 }
 0x152   : > { %p3660_p2 = pneg %p3659_p4 }
 0x154   : > { %p3667_p0 = pnand %p3666_p10, %p3660_p2 }
 0x156   : > { %3670 = shalt.err (!%p3667_p0)
}
 0x157   : > { %3100 = dma.hbm_to_vmem [thread:$0]  (!%p5378_p5), %s5379_s16, 16, %s588_s0, [#allocation29]  }
 0x158   : > { %s4083_s9 = smov [#allocation31]   ;;  %s5380_s17 = sld [smem:[#allocation73_spill]] }
 0x159   : > { %s597_s11 = sshll.u32 %s4083_s9, 4  ;;  %s598_s11 = int_to_ptr.vmem [resolvable:$true] %s597_s11 }
 0x15e   : > { %s3671_s26 = scalar_lea.hbm %s5380_s17, 512 }
 0x15f   : > { %p3672_p1 = scmp.ne.s32.totalorder %s5380_s17, %s3671_s26  ;;  %p3678_p13 = scmp.lt.u32.totalorder %s3671_s26, %s5380_s17 }
 0x161   : > { %p3674_p0 = pnand %p3672_p1, %p5377_p6 }
 0x163   : > { %p3675_p11 = pneg %p3674_p0 }
 0x165   : > { %p3680_p12 = pnand %p3678_p13, %p3675_p11 }
 0x167   : > { %3683 = shalt.err (!%p3680_p12)
}
 0x168   : > { %s3684_s0 = scalar_lea.vmem %s598_s11, 512  ;;  %p3692_p2 = scmp.lt.s32.totalorder %s598_s11, %s598_s11 }
 0x169   : > { %p3685_p8 = scmp.ne.s32.totalorder %s598_s11, %s3684_s0  ;;  %p3693_p7 = scmp.lt.s32.totalorder %s3684_s0, %s3684_s0 }
 0x16b   : > { %p3687_p3 = pnand %p3685_p8, %p5377_p6  ;;  %p3694_p9 = por %p3693_p7, %p3692_p2 }
 0x16d   : > { %p3688_p4 = pneg %p3687_p3 }
 0x16f   : > { %p3695_p10 = pnand %p3694_p9, %p3688_p4 }
 0x171   : > { %3698 = shalt.err (!%p3695_p10)
}
 0x172   : > { %s5381_s8 = sld [smem:[#allocation48_spill]]  ;;  %s5382_s1 = sld [smem:[#allocation47_spill]] }
 0x173   : > { %s5383_s27 = sld [smem:[#allocation51_spill]]  ;;  %s5384_s30 = sld [smem:[#allocation46_spill]] }
 0x174   : > { %3103 = dma.hbm_to_vmem [thread:$0]  (!%p5378_p5), %s5380_s17, 512, %s598_s11, [#allocation32], %s5374_s29, %s5374_s29, %s5373_s10  }
 0x175   : > { %s2792_s9 = sadd.s32 4294967294, %s4067_s2   ;;  %s64_s7 = sadd.s32 1, %s4059_s21 }
 0x176   : > { %p65_p6 = scmp.ge.s32.totalorder %s64_s7, 2  ;;  %s67_s13 = sadd.s32 1, %s4063_s22 }
 0x177   : > { %s74_s26 = sadd.s32 1, %s4047_s19  ;;  %p5385_p0 = scmp.eq.s32.totalorder %s4067_s2, 0 }
 0x178   : > { %p81_p1 = scmp.ne.s32.totalorder %s4047_s19, %s5381_s8  ;;  %s5457_s7 = smov (%p65_p6, %s64_s7), 0 }
 0x179   : > { %s5459_s13 = smov (!%p65_p6, %s67_s13), %s4063_s22  ;;  %p87_p11 = scmp.ne.s32.totalorder %s5381_s8, %s5382_s1 }
 0x17a   : > { %p4637_p5 = por %p5385_p0, %p81_p1  ;;  %p69_p13 = scmp.ge.s32.totalorder %s5459_s13, 2 }
 0x17b   : > { %s139_s29 = ssub.s32 %s4059_s21, %s5457_s7  ;;  %p5387_p12 = scmp.eq.s32.totalorder %s5383_s27, 0 }
 0x17c   : > { %p140_p3 = scmp.eq.s32.totalorder %s139_s29, 0  ;;  %s5461_s13 = smov (%p69_p13, %s5459_s13), 0 }
 0x17d   : > { %p4650_p8 = por %p5387_p12, %p87_p11  ;;  %5389 = sst [smem:[#allocation55_spill]] %s5461_s13 }
 0x17e   : > { %s142_s23 = sadd.s32 1, %s5384_s30  ;;  %p528_p4 = scmp.eq.s32.totalorder %s5383_s27, 3 }
 0x17f   : > { %s5388_s11 = scalar_select %p4650_p8, 1, 0 }
 0x180   : > { %s71_s5 = ssub.s32 %s4063_s22, %s5461_s13  ;;  %p534_p2 = scmp.eq.s32.totalorder %s2792_s9, 3 }
 0x181   : > { %p72_p7 = scmp.eq.s32.totalorder %s71_s5, 0  ;;  %p4663_p9 = por %p528_p4, %p81_p1 }
 0x182   : > { %s5463_s30 = smov (!%p140_p3, %s5384_s30), %s142_s23  ;;  %p4676_p10 = por %p534_p2, %p87_p11 }
 0x183   : > { %s5390_s15 = scalar_select %p4663_p9, 1, 0 }
 0x184   : > { %s4671_s20 = scalar_select %p72_p7, %s4047_s19, %s74_s26  }
 0x185   : > { %s5391_s0 = scalar_select %p4676_p10, 1, 0 }
 0x186   : > { %s611_s4 = sand.u32 1, %s4047_s19   ;;  %s2913_s27 = sshll.u32 %s4063_s22, 8 }
 0x187   : > { %s2800_s18 = sshll.u32 %s611_s4, 4  ;;  %s5392_s5 = sld [smem:[#allocation56_spill]] }
 0x188   : > { %s615_s23 = scalar_lea.vmem [#allocation4], %s2800_s18  ;;  %p5393_p6 = scmp.lt.s32.totalorder %s4067_s2, 4 }
 0x189   : > { %s622_s16 = sshll.u32 %s615_s23, 4  ;;  %s5395_s17 = sld [smem:[#allocation60_spill]]  ;;  %s4687_s16 = int_to_ptr.vmem [resolvable:$true] %s622_s16 }
 0x18a   : > { %p4693_p1 = pnand %p5393_p6, %p4637_p5  ;;  %s652_s29 = scalar_lea.vmem [#allocation12], %s4343_s6 }
 0x18b   : > { %s4704_s9 = sshll.u32 %s652_s29, 4  ;;  %s4706_s18 = scalar_lea.sflag [#allocation5], %s611_s4  ;;  %s660_s9 = int_to_ptr.vmem [resolvable:$true] %s4704_s9 }
 0x18c   : > { %p3701_p11 = pneg %p4693_p1 }
 0x18d   : > { %s4685_s3 = scalar_lea.hbm %s5392_s5, %s2913_s27  ;;  %s3704_s1 = scalar_lea.hbm %s5392_s5, 512 }
 0x18e   : > { %s3699_s23 = scalar_lea.hbm %s4685_s3, 256  ;;  %p3705_p12 = scmp.lt.u32.totalorder %s4685_s3, %s5392_s5 }
 0x18f   : > { %s4701_s27 = scalar_lea.hbm %s5395_s17, %s4346_s14  ;;  %p3700_p0 = scmp.ne.s32.totalorder %s4685_s3, %s3699_s23 }
 0x190   : > { %p3706_p3 = scmp.lt.u32.totalorder %s3704_s1, %s3699_s23  ;;  %p3708_p2 = scmp.lt.u32.totalorder %s3699_s23, %s4685_s3 }
 0x191   : > { %p3702_p5 = pnand %p3701_p11, %p3700_p0 }
 0x192   : > { %p3707_p4 = por %p3706_p3, %p3705_p12 }
 0x193   : > { %p3703_p13 = pneg %p3702_p5 }
 0x194   : > { %p3709_p7 = por %p3708_p2, %p3707_p4 }
 0x196   : > { %p3710_p6 = pnand %p3709_p7, %p3703_p13 }
 0x198   : > { %3713 = shalt.err (!%p3710_p6)
}
 0x199   : > { %s3714_s4 = scalar_lea.vmem %s4687_s16, 256  ;;  %s4084_s25 = smov [#allocation4]  }
 0x19a   : > { %p3715_p0 = scmp.ne.s32.totalorder %s4687_s16, %s3714_s4  ;;  %s3719_s29 = sshll.u32 %s4084_s25, 4  ;;  %s3720_s29 = int_to_ptr.vmem [resolvable:$false] %s3719_s29 }
 0x19b   : > { %s3721_s13 = scalar_lea.vmem %s3720_s29, 512  ;;  %p3722_p9 = scmp.lt.s32.totalorder %s4687_s16, %s3720_s29 }
 0x19c   : > { %p3717_p5 = pnand %p3715_p0, %p3701_p11  ;;  %p3723_p12 = scmp.lt.s32.totalorder %s3721_s13, %s3714_s4 }
 0x19e   : > { %p3718_p10 = pneg %p3717_p5  ;;  %p3724_p3 = por %p3723_p12, %p3722_p9 }
 0x1a0   : > { %p3725_p4 = pnand %p3724_p3, %p3718_p10 }
 0x1a2   : > { %3728 = shalt.err (!%p3725_p4)
}
 0x1a3   : > { %s5396_s23 = smov 8   ;;  %s5319_s10 = sshll.u32 %s4343_s6, 1 }
 0x1a4   : > { %3107 = dma.hbm_to_vmem [thread:$0]  (!%p4693_p1), %s4685_s3, 256, %s4687_s16, %s4706_s18, %s5371_s28, %s5371_s28, %s5396_s23  }
 0x1a5   : > { %s3729_s1 = scalar_lea.hbm %s4701_s27, 16  ;;  %p5397_p10 = scmp.ne.s32.totalorder %s5362_s12, 0 }
 0x1a6   : > { %p3730_p9 = scmp.ne.s32.totalorder %s4701_s27, %s3729_s1  ;;  %s3734_s4 = scalar_lea.hbm %s5395_s17, 32 }
 0x1a7   : > { %p3735_p2 = scmp.lt.u32.totalorder %s4701_s27, %s5395_s17  ;;  %p3736_p7 = scmp.lt.u32.totalorder %s3734_s4, %s3729_s1 }
 0x1a8   : > { %p3732_p11 = pnand %p3730_p9, %p5397_p10  ;;  %p3738_p0 = scmp.lt.u32.totalorder %s3729_s1, %s4701_s27 }
 0x1a9   : > { %p3737_p6 = por %p3736_p7, %p3735_p2 }
 0x1aa   : > { %p3733_p13 = pneg %p3732_p11 }
 0x1ab   : > { %p3739_p5 = por %p3738_p0, %p3737_p6 }
 0x1ad   : > { %p3740_p1 = pnand %p3739_p5, %p3733_p13 }
 0x1af   : > { %3743 = shalt.err (!%p3740_p1)
}
 0x1b0   : > { %s3744_s16 = scalar_lea.vmem %s660_s9, 16  ;;  %s4085_s28 = smov [#allocation12]  }
 0x1b1   : > { %p3745_p12 = scmp.ne.s32.totalorder %s660_s9, %s3744_s16  ;;  %s3749_s3 = sshll.u32 %s4085_s28, 4  ;;  %s3750_s3 = int_to_ptr.vmem [resolvable:$false] %s3749_s3 }
 0x1b2   : > { %s3751_s18 = scalar_lea.vmem %s3750_s3, 32  ;;  %p3752_p9 = scmp.lt.s32.totalorder %s660_s9, %s3750_s3 }
 0x1b3   : > { %p3747_p3 = pnand %p3745_p12, %p5397_p10  ;;  %p3753_p11 = scmp.lt.s32.totalorder %s3751_s18, %s3744_s16 }
 0x1b5   : > { %p3748_p4 = pneg %p3747_p3  ;;  %p3754_p8 = por %p3753_p11, %p3752_p9 }
 0x1b7   : > { %p3755_p2 = pnand %p3754_p8, %p3748_p4 }
 0x1b9   : > { %3758 = shalt.err (!%p3755_p2)
}
 0x1ba   : > { %p5398_p7 = scmp.ne.s32.totalorder %s5355_s24, 0  ;;  %s5399_s13 = sld [smem:[#allocation54_spill]] }
 0x1bb   : > { %s5320_s1 = sshll.u32 %s4059_s21, 5  ;;  %s5401_s4 = sld [smem:[#allocation62_spill]] }
 0x1bc   : > { %s691_s29 = scalar_lea.vmem [#allocation15], %s5319_s10 }
 0x1bd   : > { %s699_s16 = sshll.u32 %s691_s29, 4  ;;  %s700_s16 = int_to_ptr.vmem [resolvable:$true] %s699_s16 }
 0x1c0   : > { %s5400_s23 = scalar_lea.sflag [#allocation11], %s5399_s13 }
 0x1c1   : > { %3113 = dma.hbm_to_vmem [thread:$0]  (!%p5398_p7), %s4701_s27, 16, %s660_s9, %s5400_s23  }
 0x1c2   : > { %s4764_s25 = scalar_lea.hbm %s5401_s4, %s5320_s1  ;;  %s3764_s3 = scalar_lea.hbm %s5401_s4, 64 }
 0x1c3   : > { %s3759_s28 = scalar_lea.hbm %s4764_s25, 32  ;;  %p3765_p0 = scmp.lt.u32.totalorder %s4764_s25, %s5401_s4 }
 0x1c4   : > { %p3760_p8 = scmp.ne.s32.totalorder %s4764_s25, %s3759_s28  ;;  %p3766_p5 = scmp.lt.u32.totalorder %s3764_s3, %s3759_s28 }
 0x1c5   : > { %p3768_p12 = scmp.lt.u32.totalorder %s3759_s28, %s4764_s25 }
 0x1c6   : > { %p3762_p13 = pnand %p3760_p8, %p5397_p10  ;;  %p3767_p1 = por %p3766_p5, %p3765_p0 }
 0x1c8   : > { %p3763_p6 = pneg %p3762_p13  ;;  %p3769_p3 = por %p3768_p12, %p3767_p1 }
 0x1ca   : > { %p3770_p4 = pnand %p3769_p3, %p3763_p6 }
 0x1cc   : > { %3773 = shalt.err (!%p3770_p4)
}
 0x1cd   : > { %s3774_s8 = scalar_lea.vmem %s700_s16, 32  ;;  %s4086_s26 = smov [#allocation15]  }
 0x1ce   : > { %p3775_p9 = scmp.ne.s32.totalorder %s700_s16, %s3774_s8  ;;  %s3779_s29 = sshll.u32 %s4086_s26, 4  ;;  %s3780_s29 = int_to_ptr.vmem [resolvable:$false] %s3779_s29 }
 0x1cf   : > { %s3781_s27 = scalar_lea.vmem %s3780_s29, 64  ;;  %p3782_p8 = scmp.lt.s32.totalorder %s700_s16, %s3780_s29 }
 0x1d0   : > { %p3777_p11 = pnand %p3775_p9, %p5397_p10  ;;  %p3783_p13 = scmp.lt.s32.totalorder %s3781_s27, %s3774_s8 }
 0x1d2   : > { %p3778_p2 = pneg %p3777_p11  ;;  %p3784_p7 = por %p3783_p13, %p3782_p8 }
 0x1d4   : > { %p3785_p0 = pnand %p3784_p7, %p3778_p2 }
 0x1d6   : > { %3788 = shalt.err (!%p3785_p0)
}
 0x1d7   : > { %p5402_p5 = scmp.ne.s32.totalorder %s5355_s24, 0  ;;  %s5403_s28 = scalar_lea.sflag [#allocation14], %s5399_s13 }
 0x1d8   : > { %s5404_s18 = sld [smem:[#allocation64_spill]]  ;;  %s730_s8 = scalar_lea.vmem [#allocation18], %s4343_s6 }
 0x1d9   : > { %3119 = dma.hbm_to_vmem [thread:$0]  (!%p5402_p5), %s4764_s25, 32, %s700_s16, %s5403_s28  }
 0x1da   : > { %s737_s26 = sshll.u32 %s730_s8, 4  ;;  %s738_s26 = int_to_ptr.vmem [resolvable:$true] %s737_s26 }
 0x1de   : > { %s4791_s23 = scalar_lea.hbm %s5404_s18, %s4346_s14  ;;  %s3794_s25 = scalar_lea.hbm %s5404_s18, 32 }
 0x1df   : > { %s3789_s29 = scalar_lea.hbm %s4791_s23, 16  ;;  %p3795_p12 = scmp.lt.u32.totalorder %s4791_s23, %s5404_s18 }
 0x1e0   : > { %p3790_p7 = scmp.ne.s32.totalorder %s4791_s23, %s3789_s29  ;;  %p3796_p3 = scmp.lt.u32.totalorder %s3794_s25, %s3789_s29 }
 0x1e1   : > { %p3798_p9 = scmp.lt.u32.totalorder %s3789_s29, %s4791_s23 }
 0x1e2   : > { %p3792_p6 = pnand %p3790_p7, %p5397_p10  ;;  %p3797_p4 = por %p3796_p3, %p3795_p12 }
 0x1e4   : > { %p3793_p1 = pneg %p3792_p6  ;;  %p3799_p11 = por %p3798_p9, %p3797_p4 }
 0x1e6   : > { %p3800_p2 = pnand %p3799_p11, %p3793_p1 }
 0x1e8   : > { %3803 = shalt.err (!%p3800_p2)
}
 0x1e9   : > { %s3804_s9 = scalar_lea.vmem %s738_s26, 16  ;;  %s4087_s3 = smov [#allocation18]  }
 0x1ea   : > { %p3805_p8 = scmp.ne.s32.totalorder %s738_s26, %s3804_s9  ;;  %s3809_s8 = sshll.u32 %s4087_s3, 4  ;;  %s3810_s8 = int_to_ptr.vmem [resolvable:$false] %s3809_s8 }
 0x1eb   : > { %s3811_s10 = scalar_lea.vmem %s3810_s8, 32  ;;  %p3812_p7 = scmp.lt.s32.totalorder %s738_s26, %s3810_s8 }
 0x1ec   : > { %p3807_p13 = pnand %p3805_p8, %p5397_p10  ;;  %p3813_p6 = scmp.lt.s32.totalorder %s3811_s10, %s3804_s9 }
 0x1ee   : > { %p3808_p0 = pneg %p3807_p13  ;;  %p3814_p5 = por %p3813_p6, %p3812_p7 }
 0x1f0   : > { %p3815_p3 = pnand %p3814_p5, %p3808_p0 }
 0x1f2   : > { %3818 = shalt.err (!%p3815_p3)
}
 0x1f3   : > { %p5405_p12 = scmp.ne.s32.totalorder %s5355_s24, 0  ;;  %s5406_s29 = scalar_lea.sflag [#allocation17], %s5399_s13 }
 0x1f4   : > { %s5407_s16 = sld [smem:[#allocation66_spill]]  ;;  %s764_s9 = scalar_lea.vmem [#allocation21], %s4343_s6 }
 0x1f5   : > { %3125 = dma.hbm_to_vmem [thread:$0]  (!%p5405_p12), %s4791_s23, 16, %s738_s26, %s5406_s29  }
 0x1f6   : > { %s771_s3 = sshll.u32 %s764_s9, 4  ;;  %s772_s3 = int_to_ptr.vmem [resolvable:$true] %s771_s3 }
 0x1fa   : > { %s4817_s28 = scalar_lea.hbm %s5407_s16, %s4346_s14  ;;  %s3824_s23 = scalar_lea.hbm %s5407_s16, 32 }
 0x1fb   : > { %s3819_s8 = scalar_lea.hbm %s4817_s28, 16  ;;  %p3825_p9 = scmp.lt.u32.totalorder %s4817_s28, %s5407_s16 }
 0x1fc   : > { %p3820_p5 = scmp.ne.s32.totalorder %s4817_s28, %s3819_s8  ;;  %p3826_p11 = scmp.lt.u32.totalorder %s3824_s23, %s3819_s8 }
 0x1fd   : > { %p3828_p8 = scmp.lt.u32.totalorder %s3819_s8, %s4817_s28 }
 0x1fe   : > { %p3822_p1 = pnand %p3820_p5, %p5397_p10  ;;  %p3827_p2 = por %p3826_p11, %p3825_p9 }
 0x200   : > { %p3823_p4 = pneg %p3822_p1  ;;  %p3829_p13 = por %p3828_p8, %p3827_p2 }
 0x202   : > { %p3830_p0 = pnand %p3829_p13, %p3823_p4 }
 0x204   : > { %3833 = shalt.err (!%p3830_p0)
}
 0x205   : > { %s3834_s27 = scalar_lea.vmem %s772_s3, 16  ;;  %s4088_s25 = smov [#allocation21]  }
 0x206   : > { %p3835_p7 = scmp.ne.s32.totalorder %s772_s3, %s3834_s27  ;;  %s3839_s9 = sshll.u32 %s4088_s25, 4  ;;  %s3840_s9 = int_to_ptr.vmem [resolvable:$false] %s3839_s9 }
 0x207   : > { %s3841_s1 = scalar_lea.vmem %s3840_s9, 32  ;;  %p3842_p5 = scmp.lt.s32.totalorder %s772_s3, %s3840_s9 }
 0x208   : > { %p3837_p6 = pnand %p3835_p7, %p5397_p10  ;;  %p3843_p1 = scmp.lt.s32.totalorder %s3841_s1, %s3834_s27 }
 0x20a   : > { %p3838_p3 = pneg %p3837_p6  ;;  %p3844_p12 = por %p3843_p1, %p3842_p5 }
 0x20c   : > { %p3845_p9 = pnand %p3844_p12, %p3838_p3 }
 0x20e   : > { %3848 = shalt.err (!%p3845_p9)
}
 0x20f   : > { %p5408_p11 = scmp.ne.s32.totalorder %s5355_s24, 0  ;;  %s5409_s8 = scalar_lea.sflag [#allocation20], %s5399_s13 }
 0x210   : > { %s5410_s10 = sshll.u32 %s4059_s21, 5  ;;  %s5411_s29 = sld [smem:[#allocation68_spill]] }
 0x211   : > { %3131 = dma.hbm_to_vmem [thread:$0]  (!%p5408_p11), %s4817_s28, 16, %s772_s3, %s5409_s8  }
 0x212   : > { %s5413_s9 = sshll.u32 %s4343_s6, 1 }
 0x213   : > { %s803_s27 = scalar_lea.vmem [#allocation24], %s5413_s9 }
 0x214   : > { %s811_s1 = sshll.u32 %s803_s27, 4  ;;  %s812_s1 = int_to_ptr.vmem [resolvable:$true] %s811_s1 }
 0x216   : > { %s5412_s25 = smov %s5411_s29  ;;  %s4844_s4 = scalar_lea.hbm %s5411_s29, %s5410_s10 }
 0x217   : > { %s3849_s5 = scalar_lea.hbm %s4844_s4, 32  ;;  %s3854_s8 = scalar_lea.hbm %s5412_s25, 64 }
 0x218   : > { %p3850_p12 = scmp.ne.s32.totalorder %s4844_s4, %s3849_s5  ;;  %p3855_p8 = scmp.lt.u32.totalorder %s4844_s4, %s5412_s25 }
 0x219   : > { %p3856_p13 = scmp.lt.u32.totalorder %s3854_s8, %s3849_s5  ;;  %p3858_p7 = scmp.lt.u32.totalorder %s3849_s5, %s4844_s4 }
 0x21a   : > { %p3852_p4 = pnand %p3850_p12, %p5397_p10 }
 0x21b   : > { %p3857_p0 = por %p3856_p13, %p3855_p8 }
 0x21c   : > { %p3853_p2 = pneg %p3852_p4 }
 0x21d   : > { %p3859_p6 = por %p3858_p7, %p3857_p0 }
 0x21f   : > { %p3860_p3 = pnand %p3859_p6, %p3853_p2 }
 0x221   : > { %3863 = shalt.err (!%p3860_p3)
}
 0x222   : > { %s3864_s26 = scalar_lea.vmem %s812_s1, 32  ;;  %s4089_s29 = smov [#allocation24]  }
 0x223   : > { %p3865_p5 = scmp.ne.s32.totalorder %s812_s1, %s3864_s26  ;;  %s3869_s9 = sshll.u32 %s4089_s29, 4  ;;  %s3870_s9 = int_to_ptr.vmem [resolvable:$false] %s3869_s9 }
 0x224   : > { %s3871_s27 = scalar_lea.vmem %s3870_s9, 64  ;;  %p3872_p12 = scmp.lt.s32.totalorder %s812_s1, %s3870_s9 }
 0x225   : > { %p3867_p1 = pnand %p3865_p5, %p5397_p10  ;;  %p3873_p4 = scmp.lt.s32.totalorder %s3871_s27, %s3864_s26 }
 0x227   : > { %p3868_p9 = pneg %p3867_p1  ;;  %p3874_p11 = por %p3873_p4, %p3872_p12 }
 0x229   : > { %p3875_p8 = pnand %p3874_p11, %p3868_p9 }
 0x22b   : > { %3878 = shalt.err (!%p3875_p8)
}
 0x22c   : > { %p5414_p13 = scmp.ne.s32.totalorder %s5355_s24, 0  ;;  %s5415_s5 = scalar_lea.sflag [#allocation23], %s5399_s13 }
 0x22d   : > { %s5416_s8 = sld [smem:[#allocation70_spill]]  ;;  %s842_s10 = scalar_lea.vmem [#allocation27], %s4343_s6 }
 0x22e   : > { %3137 = dma.hbm_to_vmem [thread:$0]  (!%p5414_p13), %s4844_s4, 32, %s812_s1, %s5415_s5  }
 0x22f   : > { %s849_s26 = sshll.u32 %s842_s10, 4  ;;  %s850_s26 = int_to_ptr.vmem [resolvable:$true] %s849_s26 }
 0x233   : > { %s4871_s23 = scalar_lea.hbm %s5416_s8, %s4346_s14  ;;  %s3884_s4 = scalar_lea.hbm %s5416_s8, 32 }
 0x234   : > { %s3879_s29 = scalar_lea.hbm %s4871_s23, 16  ;;  %p3885_p7 = scmp.lt.u32.totalorder %s4871_s23, %s5416_s8 }
 0x235   : > { %p3880_p11 = scmp.ne.s32.totalorder %s4871_s23, %s3879_s29  ;;  %p3886_p6 = scmp.lt.u32.totalorder %s3884_s4, %s3879_s29 }
 0x236   : > { %p3888_p5 = scmp.lt.u32.totalorder %s3879_s29, %s4871_s23 }
 0x237   : > { %p3882_p2 = pnand %p3880_p11, %p5397_p10  ;;  %p3887_p3 = por %p3886_p6, %p3885_p7 }
 0x239   : > { %p3883_p0 = pneg %p3882_p2  ;;  %p3889_p1 = por %p3888_p5, %p3887_p3 }
 0x23b   : > { %p3890_p9 = pnand %p3889_p1, %p3883_p0 }
 0x23d   : > { %3893 = shalt.err (!%p3890_p9)
}
 0x23e   : > { %s3894_s6 = scalar_lea.vmem %s850_s26, 16  ;;  %s4090_s14 = smov [#allocation27]  }
 0x23f   : > { %p3895_p12 = scmp.ne.s32.totalorder %s850_s26, %s3894_s6  ;;  %s3899_s28 = sshll.u32 %s4090_s14, 4  ;;  %s3900_s28 = int_to_ptr.vmem [resolvable:$false] %s3899_s28 }
 0x240   : > { %s3901_s3 = scalar_lea.vmem %s3900_s28, 32  ;;  %p3902_p11 = scmp.lt.s32.totalorder %s850_s26, %s3900_s28 }
 0x241   : > { %p3897_p4 = pnand %p3895_p12, %p5397_p10  ;;  %p3903_p2 = scmp.lt.s32.totalorder %s3901_s3, %s3894_s6 }
 0x243   : > { %p3898_p8 = pneg %p3897_p4  ;;  %p3904_p13 = por %p3903_p2, %p3902_p11 }
 0x245   : > { %p3905_p6 = pnand %p3904_p13, %p3898_p8 }
 0x247   : > { %3908 = shalt.err (!%p3905_p6)
}
 0x248   : > { %p5417_p7 = scmp.ne.s32.totalorder %s5355_s24, 0  ;;  %s5418_s10 = scalar_lea.sflag [#allocation26], %s5399_s13 }
 0x249   : > { %s5419_s29 = sld [smem:[#allocation53_spill]] }
 0x24a   : > { %3143 = dma.hbm_to_vmem [thread:$0]  (!%p5417_p7), %s4871_s23, 16, %s850_s26, %s5418_s10  }
 0x24f   : > { %p5420_p0 = scmp.ne.s32.totalorder %s5419_s29, 0 }
 0x250   : > { %s5421_s12 = sld [smem:[#allocation48_spill]] (!%p5420_p0)  ;;  %p5422_p10 = scmp.ne.s32.totalorder (!%p5420_p0), %s5388_s11, 0 }
 0x251   : > { %858 = sbr.rel (%p5420_p0) target bundleno = 3968 (0xf80), region = 92 }
 0x256   : > { %s4896_s9 = sand.u32 (!%p5420_p0), 1, %s5421_s12  }
 0x257   : > { %s2828_s27 = sshll.u32 (!%p5420_p0), %s4896_s9, 4  ;;  %s861_s4 = scalar_lea.sflag (!%p5420_p0), [#allocation5], %s4896_s9 }
 0x258   : > { %s4900_s1 = scalar_lea.vmem [#allocation4], %s2828_s27 }
 0x259   : > { %3982 = dma.done.wait (%p5422_p10), %s861_s4, 256  }
 0x25a   : > { %3984 = vsyncadd (%p5422_p10), %s861_s4, 4294967040  ;;  %s5423_s24 = sld [smem:[#allocation51_spill]] }
 0x260   : > { %p5424_p13 = scmp.eq.s32.totalorder %s5423_s24, 0 }
 0x262   : > { %3986 = dma.done.wait (%p5424_p13), [#allocation8], 32   ;;  %p5425_p3 = pmov %p5424_p13 }
 0x263   : > { %s5426_s13 = sld [smem:[#allocation45_spill]]  ;;  %s4911_s26 = sand.u32 1, %s5423_s24  }
 0x264   : > { %3988 = vsyncadd (%p5425_p3), [#allocation8], 4294967264  ;;  %s5427_s23 = sld [smem:[#allocation52_spill]]  ;;  %s878_s6 = scalar_lea.sflag [#allocation11], %s4911_s26 }
 0x269   : > { %s4914_s5 = sand.u32 1, %s5426_s13  }
 0x26a   : > { %p5428_p5 = scmp.ne.s32.totalorder %s5427_s23, 0 }
 0x26c   : > { %3990 = dma.done.wait (%p5428_p5), %s878_s6, 32  }
 0x26d   : > { %3992 = vsyncadd (%p5428_p5), %s878_s6, 4294967264  ;;  %s2831_s11 = sshll.u32 %s4914_s5, 6  ;;  %s894_s3 = scalar_lea.sflag [#allocation14], %s4911_s26 }
 0x26e   : > { %s4925_s10 = scalar_lea.vmem [#allocation13], %s2831_s11 }
 0x26f   : > { %3994 = dma.done.wait (%p5428_p5), %s894_s3, 1056  }
 0x270   : > { %3996 = vsyncadd (%p5428_p5), %s894_s3, 4294966240  ;;  %s2832_s29 = sshll.u32 %s4914_s5, 1  ;;  %s2833_s12 = sshll.u32 %s4914_s5, 5 }
 0x271   : > { %s4933_s27 = scalar_lea.vmem [#allocation15], %s2832_s29  ;;  %s912_s4 = scalar_lea.sflag [#allocation17], %s4911_s26 }
 0x272   : > { %s4936_s13 = scalar_lea.vmem [#allocation16], %s2833_s12 }
 0x273   : > { %3998 = dma.done.wait (%p5428_p5), %s912_s4, 528  }
 0x274   : > { %4000 = vsyncadd (%p5428_p5), %s912_s4, 4294966768  ;;  %s929_s3 = scalar_lea.sflag [#allocation20], %s4911_s26 }
 0x275   : > { %4002 = dma.done.wait (%p5428_p5), %s929_s3, 32  }
 0x276   : > { %4004 = vsyncadd (%p5428_p5), %s929_s3, 4294967264  ;;  %s939_s12 = scalar_lea.vmem [#allocation21], %s4914_s5  ;;  %s945_s14 = scalar_lea.sflag [#allocation23], %s4911_s26 }
 0x277   : > { %s4951_s8 = scalar_lea.vmem [#allocation22], %s2831_s11 }
 0x278   : > { %4006 = dma.done.wait (%p5428_p5), %s945_s14, 1056  }
 0x279   : > { %4008 = vsyncadd (%p5428_p5), %s945_s14, 4294966240  ;;  %s2836_s4 = sshll.u32 %s4914_s5, 7  ;;  %s4958_s28 = scalar_lea.vmem [#allocation24], %s2832_s29 }
 0x27a   : > { %s963_s6 = scalar_lea.sflag [#allocation26], %s4911_s26  ;;  %s4961_s3 = scalar_lea.vmem [#allocation25], %s2836_s4 }
 0x27b   : > { %4010 = dma.done.wait (%p5428_p5), %s963_s6, 2064  }
 0x27c   : > { %4012 = vsyncadd (%p5428_p5), %s963_s6, 4294965232  ;;  %s974_s11 = scalar_lea.vmem [#allocation27], %s4914_s5  ;;  %p5429_p1 = pmov %p5425_p3 }
 0x27e   : > { %4014 = dma.done.wait (%p5429_p1), [#allocation29], 32   ;;  %p5430_p9 = pmov %p5429_p1 }
 0x27f   : > { %p5431_p12 = pmov %p5429_p1 }
 0x280   : > { %4016 = vsyncadd (%p5430_p9), [#allocation29], 4294967264 }
 0x281   : > { %4018 = dma.done.wait (%p5431_p12), [#allocation32], 512   ;;  %p5432_p4 = pmov %p5429_p1 }
 0x282   : > { %s2840_s26 = sshll.u32 %s4896_s9, 2  ;;  %s5433_s23 = sld [smem:[#allocation49_spill]] }
 0x283   : > { %4020 = vsyncadd (%p5432_p4), [#allocation32], 4294966784  ;;  %s4977_s14 = scalar_lea.vmem [#allocation33], %s2840_s26 }
 0x288   : > { %p2841_p8 = scmp.ne.s32.totalorder %s5433_s23, 0 }
 0x289   : > { %v1098_v0 = vld [vmem:[%s4900_s1] sm:$0xff] (!%p2841_p8)  ;;  %vm1102_vm0 = vcmask (!%p2841_p8), 523264   ;;  %v1099_v1 = vld [vmem:[%s4900_s1 + $0x8] sm:$0xf] (!%p2841_p8)  ;;  %vm1106_vm1 = vcmask (!%p2841_p8), 519168  }
 0x28a   : > { %1097 = sbr.rel (%p2841_p8) target bundleno = 968 (0x3c8), region = 168  ;;  %v1103_v2 = vsel (!%p2841_p8), %vm1102_vm0, %v1098_v0, 0.0  ;;  %v1107_v3 = vsel (!%p2841_p8), %vm1106_vm1, %v1099_v1, 0.0  ;;  %v2842_v21 = vld [vmem:[#allocation7] ss:$0 sm:$0xff] (!%p2841_p8) }
 0x28b   : > { %1104 = vadd.xlane.f32.xlu0 (!%p2841_p8), %v1103_v2  ;;  %v2843_v23 = vld [vmem:[#allocation9] ss:$0 sm:$0xff] (!%p2841_p8) }
 0x28f   : > { %1108 = vadd.xlane.f32.xlu0 (!%p2841_p8), %v1107_v3 }
 0x318   : > { %v1105_v4 = vpop.xlane.xlu0 %1104 }
 0x319   : > { %v1111_v5 = vmul.f32 0.015625, %v1105_v4 }
 0x31b   : > { %v1113_v6 = vsub.f32 %v1098_v0, %v1111_v5 }
 0x31c   : > { %v1109_v7 = vpop.xlane.xlu0 %1108 }
 0x31d   : > { %v1112_v8 = vmul.f32 0.015625, %v1109_v7  ;;  %v1115_v9 = vmul.f32 %v1113_v6, %v1113_v6 }
 0x31f   : > { %v1114_v10 = vsub.f32 %v1099_v1, %v1112_v8  ;;  %v1117_v11 = vsel %vm1102_vm0, %v1115_v9, 0.0 }
 0x320   : > { %1118 = vadd.xlane.f32.xlu1 %v1117_v11 }
 0x321   : > { %v1116_v12 = vmul.f32 %v1114_v10, %v1114_v10 }
 0x323   : > { %v1120_v13 = vsel %vm1106_vm1, %v1116_v12, 0.0 }
 0x324   : > { %1121 = vadd.xlane.f32.xlu1 %v1120_v13 }
 0x3ad   : > { %v1119_v14 = vpop.xlane.xlu1 %1118 }
 0x3ae   : > { %v1123_v15 = vmul.f32 0.015625, %v1119_v14 }
 0x3b0   : > { %v1125_v16 = vadd.f32 1e-05, %v1123_v15 }
 0x3b1   : > { %v1122_v17 = vpop.xlane.xlu1 %1121 }
 0x3b2   : > { %3269 = vrsqrt.f32 %v1125_v16  ;;  %v1124_v18 = vmul.f32 0.015625, %v1122_v17 }
 0x3b4   : > { %v1126_v19 = vadd.f32 1e-05, %v1124_v18 }
 0x3b6   : > { %3271 = vrsqrt.f32 %v1126_v19 }
 0x3bc   : > { %v3270_v20 = vpop.eup %3269 }
 0x3bd   : > { %v1129_v22 = vmul.f32 %v3270_v20, %v1113_v6 }
 0x3bf   : > { %v1137_v24 = vmul.f32 %v2842_v21, %v1129_v22 }
 0x3c0   : > { %v3272_v25 = vpop.eup %3271 }
 0x3c1   : > { %v1145_v26 = vadd.f32 %v2843_v23, %v1137_v24  ;;  %v1130_v27 = vmul.f32 %v3272_v25, %v1114_v10 }
 0x3c3   : > { %1147 = vst.msk [vmem:[#allocation2] sm:$0xff] %vm1102_vm0, %v1145_v26  ;;  %v1138_v28 = vmul.f32 %v2842_v21, %v1130_v27 }
 0x3c5   : > { %v1146_v29 = vadd.f32 %v2843_v23, %v1138_v28 }
 0x3c7   : > { %1148 = vst.msk [vmem:[#allocation2 + $0x8] sm:$0xf] %vm1106_vm1, %v1146_v29 }
 0x3c8 PF: > { %vm1153_vm2 = vcmask 523264   ;;  %vm1157_vm3 = vcmask 519168   ;;  %v3273_v44 = vld [vmem:[%s4925_s10 + $0x4] ss:$8 sps:$4 sm:$0xff]   ;;  %v3275_v45 = vld [vmem:[%s4925_s10] ss:$8 sps:$4 sm:$0xff]   ;;  %v1209_v6 = vlaneseq }
 0x3c9   : > { %1262 = vmatprep.subr.bf16.mxu1 %v3273_v44  ;;  %v3276_v46 = vld [vmem:[%s4925_s10 + $0x14] ss:$8 sps:$4 sm:$0xff]   ;;  %v3278_v47 = vld [vmem:[%s4925_s10 + $0x10] ss:$8 sps:$4 sm:$0xff]   ;;  %v3279_v48 = vld [vmem:[%s4925_s10 + $0x24] ss:$8 sps:$4 sm:$0xff]  }
 0x3ca   : > { %v4988_v30 = vld [vmem:[#allocation2] sm:$0xff]  ;;  %1263 = vmatpush1.bf16.msra.mxu1 %v3275_v45  ;;  %v3281_v49 = vld [vmem:[%s4925_s10 + $0x20] ss:$8 sps:$4 sm:$0xff]   ;;  %v4091_v52 = vmov 0   ;;  %s5434_s1 = scalar_lea.vmem [#allocation10], %s4914_s5  ;;  %s5435_s24 = scalar_lea.vmem [#allocation12], %s4914_s5 }
 0x3cb   : > { %v1154_v32 = vsel %vm1153_vm2, %v4988_v30, 0.0  ;;  %1264 = vmatprep.subr.bf16.mxu1 %v3276_v46  ;;  %v3282_v50 = vld [vmem:[%s4925_s10 + $0x34] ss:$8 sps:$4 sm:$0xff]   ;;  %v3284_v51 = vld [vmem:[%s4925_s10 + $0x30] ss:$8 sps:$4 sm:$0xff]   ;;  %1294 = vmatprep.mubr.bf16.mxu1 %v4091_v52  ;;  %v5014_v7 = vshrl.u32 %v1209_v6, 7 }
 0x3cc   : > { %1155 = vadd.xlane.f32.xlu0 %v1154_v32  ;;  %v2844_v61 = vld [vmem:[%s5434_s1] ss:$0 sm:$0xff]  ;;  %v1207_v9 = vld [vmem:[%s4933_s27] sm:$0x3]  ;;  %v4092_v10 = vmov 0.0   ;;  %vm4093_vm4 = vmmov 0  }
 0x3cd   : > { %v2845_v1 = vld [vmem:[%s5435_s24] ss:$0 sm:$0xff]  ;;  %v1211_v8 = vsub.s32 0, %v5014_v7  ;;  %2980 = vmatprep.subr.bf16.mxu0 %v4092_v10  ;;  %v1215_v11 = vsub.s32 1, %v5014_v7  ;;  %2982 = vmatprep.mubr.msk.bf16.mxu0 %vm4093_vm4, %v4092_v10  ;;  %s4094_s10 = smov 48   ;;  %s4095_s29 = smov 64  }
 0x3ce   : > { %v4990_v31 = vld [vmem:[#allocation2 + $0x8] sm:$0xf]  ;;  %1265 = vmatpush1.bf16.msra.mxu1 %v3278_v47  ;;  %s4096_s27 = smov 112   ;;  %s4097_s6 = smov 96   ;;  %vm1313_vm5 = vcmask 130048   ;;  %vm1387_vm6 = vcmask 1045504  }
 0x3cf   : > { %v1158_v33 = vsel %vm1157_vm3, %v4990_v31, 0.0  ;;  %1266 = vmatprep.subr.bf16.mxu1 %v3279_v48  ;;  %v1212_v12 = vrot.slane %v1207_v9, %v1211_v8  ;;  %v1216_v14 = vrot.slane %v1207_v9, %v1215_v11  ;;  %s4098_s4 = smov 32   ;;  %s4099_s26 = smov 80   ;;  %vm1361_vm7 = vcmask 97280  }
 0x3d0   : > { %1159 = vadd.xlane.f32.xlu0 %v1158_v33  ;;  %s4100_s23 = smov 16   ;;  %vm1365_vm8 = vcmask 93184   ;;  %vm1435_vm9 = vcmask 125952   ;;  %vm1570_vm10 = vcmask 261248   ;;  %vm1572_vm11 = vcmask 257152   ;;  %s5437_s1 = scalar_lea.vmem [#allocation19], %s4914_s5 }
 0x3d1   : > { %vm1705_vm12 = vcmask 392448   ;;  %vm1707_vm13 = vcmask 388352   ;;  %vm1840_vm14 = vcmask 523648   ;;  %vm1842_vm15 = vcmask 519552  }
 0x3d2   : > { %1267 = vmatpush1.bf16.msra.mxu1 %v3281_v49 }
 0x3d3   : > { %1268 = vmatprep.subr.bf16.mxu1 %v3282_v50 }
 0x3d6   : > { %1269 = vmatpush1.bf16.msra.mxu1 %v3284_v51 }
 0x3d7   : > { %2968 = vmatprep.subr.bf16.mxu1 %v4092_v10 }
 0x459   : > { %v1156_v34 = vpop.xlane.xlu0 %1155 }
 0x45a   : > { %v1162_v35 = vmul.f32 0.015625, %v1156_v34 }
 0x45c   : > { %v1164_v36 = vsub.f32 %v4988_v30, %v1162_v35 }
 0x45d   : > { %v1160_v37 = vpop.xlane.xlu0 %1159 }
 0x45e   : > { %v1163_v38 = vmul.f32 0.015625, %v1160_v37  ;;  %v1166_v39 = vmul.f32 %v1164_v36, %v1164_v36 }
 0x460   : > { %v1165_v40 = vsub.f32 %v4990_v31, %v1163_v38  ;;  %v1168_v41 = vsel %vm1153_vm2, %v1166_v39, 0.0 }
 0x461   : > { %1169 = vadd.xlane.f32.xlu1 %v1168_v41 }
 0x462   : > { %v1167_v42 = vmul.f32 %v1165_v40, %v1165_v40 }
 0x464   : > { %v1171_v43 = vsel %vm1157_vm3, %v1167_v42, 0.0 }
 0x465   : > { %1172 = vadd.xlane.f32.xlu1 %v1171_v43 }
 0x4ee   : > { %v1170_v53 = vpop.xlane.xlu1 %1169 }
 0x4ef   : > { %v1174_v54 = vmul.f32 0.015625, %v1170_v53 }
 0x4f1   : > { %v1176_v55 = vadd.f32 1e-05, %v1174_v54 }
 0x4f2   : > { %v1173_v56 = vpop.xlane.xlu1 %1172 }
 0x4f3   : > { %3317 = vrsqrt.f32 %v1176_v55  ;;  %v1175_v57 = vmul.f32 0.015625, %v1173_v56 }
 0x4f5   : > { %v1177_v58 = vadd.f32 1e-05, %v1175_v57 }
 0x4f7   : > { %3319 = vrsqrt.f32 %v1177_v58 }
 0x4fd   : > { %v3318_v59 = vpop.eup %3317 }
 0x4fe   : > { %v1180_v60 = vmul.f32 %v3318_v59, %v1164_v36 }
 0x500   : > { %v1188_v0 = vmul.f32 %v2844_v61, %v1180_v60 }
 0x501   : > { %v3320_v62 = vpop.eup %3319 }
 0x502   : > { %v1181_v63 = vmul.f32 %v3320_v62, %v1165_v40  ;;  %v1196_v3 = vadd.f32 %v2845_v1, %v1188_v0 }
 0x504   : > { %v1189_v2 = vmul.f32 %v2844_v61, %v1181_v63 }
 0x506   : > { %v1197_v4 = vadd.f32 %v2845_v1, %v1189_v2 }
 0x508   : > { %v1198_v5 = vpack.c.bf16 %v1197_v4, %v1196_v3 }
 0x50a   : > { %2854 = vmatmul.mubr.msk.bf16.vlgmr.msra.gmra.mrb[0].mxu1 %vm1153_vm2, %v1198_v5 }
 0x50b   : > { %2970 = vmatprep.mubr.msk.bf16.mxu1 %vm4093_vm4, %v4092_v10 }
 0x5dd   : > { %v1296_v13 = vpop.f32.mrb[0].mxu1 }
 0x5de   : > { %v1297_v15 = vadd.f32 %v1296_v13, %v1212_v12  ;;  %v1298_v16 = vpop.f32.mrb[1].mxu1 }
 0x5df   : > { %v1300_v17 = vpop.f32.mrb[2].mxu1  ;;  %v1299_v20 = vadd.f32 %v1298_v16, %v1216_v14 }
 0x5e0   : > { %v1301_v18 = vadd.f32 %v1300_v17, %v1212_v12  ;;  %v1302_v19 = vpop.f32.mrb[3].mxu1  ;;  %v1307_v22 = vmul.f32 0.25, %v1297_v15 }
 0x5e1   : > { %v1303_v21 = vadd.f32 %v1302_v19, %v1216_v14 }
 0x5e2   : > { %v1305_v23 = vpack.c.bf16 %v1301_v18, %v1297_v15  ;;  %v1308_v24 = vmul.f32 0.25, %v1301_v18 }
 0x5e3   : > { %v5029_v25 = vpack.c.bf16 %v1303_v21, %v1299_v20 }
 0x5e4   : > { %v1309_v26 = vpack.c.bf16 %v1308_v24, %v1307_v22  ;;  %1440 = vrot.lane.b32.xlu1 %v1305_v23, %s4094_s10  ;;  %1311 = vrot.lane.b32.xlu0 %v1305_v23, %s4095_s29 }
 0x5e5   : > { %v1389_v36 = vsel %vm1387_vm6, %v5029_v25, 0 }
 0x5e8   : > { %1438 = vrot.lane.b32.xlu1 %v1309_v26, %s4096_s27  ;;  %1574 = vrot.lane.b32.xlu0 %v1309_v26, %s4097_s6 }
 0x5ec   : > { %1576 = vrot.lane.b32.xlu1 %v1305_v23, %s4098_s4  ;;  %1709 = vrot.lane.b32.xlu0 %v1309_v26, %s4099_s26 }
 0x5f0   : > { %1711 = vrot.lane.b32.xlu1 %v1305_v23, %s4100_s23 }
 0x656   : > { %v1441_v27 = vpop.permute.xlu1 %1440  ;;  %v1312_v28 = vpop.permute.xlu0 %1311 }
 0x657   : > { %v1318_v29 = vsel %vm1313_vm5, %v1312_v28, 0  ;;  %v1446_v32 = vsel %vm1313_vm5, %v1441_v27, 0 }
 0x658   : > { %2969 = vmatpush3.bf16.xpose.msra.mxu1 %v1318_v29  ;;  %2981 = vmatpush3.bf16.xpose.msra.mxu0 %v1446_v32 }
 0x659   : > { %2974 = vmatprep.subr.bf16.mxu1 %v4092_v10  ;;  %2992 = vmatprep.subr.bf16.mxu0 %v4092_v10 }
 0x65a   : > { %v1439_v33 = vpop.permute.xlu1 %1438  ;;  %v1575_v38 = vpop.permute.xlu0 %1574 }
 0x65e   : > { %v1577_v34 = vpop.permute.xlu1 %1576  ;;  %v1710_v40 = vpop.permute.xlu0 %1709 }
 0x65f   : > { %v1582_v35 = vsel %vm1313_vm5, %v1577_v34, 0  ;;  %2971 = vmatmul.mubr.msk.bf16.vlgmr.msra.gmra.mrb[4].mxu1 %vm1313_vm5, %v1309_v26  ;;  %2983 = vmatmul.mubr.msk.bf16.vlgmr.msra.gmra.mrb[0].mxu0 %vm1313_vm5, %v1439_v33 }
 0x660   : > { %2975 = vmatpush3.bf16.msra.mxu1 %v1389_v36  ;;  %2993 = vmatpush3.bf16.xpose.msra.mxu0 %v1582_v35 }
 0x661   : > { %2994 = vmatprep.mubr.msk.bf16.mxu0 %vm4093_vm4, %v4092_v10  ;;  %3004 = vmatprep.subr.bf16.mxu0 %v4092_v10 }
 0x662   : > { %2976 = vmatprep.mubr.msk.bf16.mxu1 %vm4093_vm4, %v4092_v10  ;;  %2986 = vmatprep.subr.bf16.mxu1 %v4092_v10  ;;  %v1712_v37 = vpop.permute.xlu1 %1711 }
 0x663   : > { %v1717_v39 = vsel %vm1313_vm5, %v1712_v37, 0 }
 0x667   : > { %2995 = vmatmul.mubr.msk.bf16.vlgmr.msra.gmra.mrb[4].mxu0 %vm1313_vm5, %v1575_v38 }
 0x668   : > { %3005 = vmatpush3.bf16.xpose.msra.mxu0 %v1717_v39  ;;  %3006 = vmatprep.mubr.msk.bf16.mxu0 %vm4093_vm4, %v4092_v10 }
 0x669   : > { %3016 = vmatprep.subr.bf16.mxu0 %v4092_v10 }
 0x66f   : > { %3007 = vmatmul.mubr.msk.bf16.vlgmr.msra.gmra.mrb[8].mxu0 %vm1313_vm5, %v1710_v40 }
 0x670   : > { %3024 = vmatprep.mubr.msk.bf16.mxu0 %vm4093_vm4, %v4092_v10 }
 0x732   : > { %v1354_v41 = vpop.f32.mrb[4].mxu1  ;;  %v1482_v42 = vpop.f32.mrb[0].mxu0 }
 0x733   : > { %v2972_v43 = vpop.f32.mrb[5].mxu1  ;;  %v2984_v44 = vpop.f32.mrb[1].mxu0  ;;  %v1489_v45 = vsel %vm1361_vm7, %v1482_v42, -inf  ;;  %v1362_v46 = vsel %vm1361_vm7, %v1354_v41, -inf }
 0x734   : > { %v1485_v47 = vpop.f32.mrb[2].mxu0  ;;  %1490 = vmax.xlane.f32.xlu0 %v1489_v45  ;;  %1363 = vmax.xlane.f32.xlu1 %v1362_v46  ;;  %v1357_v48 = vpop.f32.mrb[6].mxu1 }
 0x735   : > { %v2973_v49 = vpop.f32.mrb[7].mxu1  ;;  %v2985_v50 = vpop.f32.mrb[3].mxu0  ;;  %v1366_v51 = vsel %vm1365_vm8, %v1357_v48, -inf  ;;  %v1492_v55 = vsel %vm1365_vm8, %v1485_v47, -inf }
 0x738   : > { %1367 = vmax.xlane.f32.xlu0 %v1366_v51 }
 0x73a   : > { %v5063_v53 = vpop.f32.mrb[4].mxu0 }
 0x73b   : > { %v2996_v54 = vpop.f32.mrb[5].mxu0  ;;  %v1625_v0 = vsel %vm1361_vm7, %v5063_v53, -inf }
 0x73c   : > { %1493 = vmax.xlane.f32.xlu0 %v1492_v55  ;;  %v1621_v56 = vpop.f32.mrb[6].mxu0 }
 0x73d   : > { %v2997_v57 = vpop.f32.mrb[7].mxu0  ;;  %v1628_v58 = vsel %vm1365_vm8, %v1621_v56, -inf }
 0x740   : > { %1629 = vmax.xlane.f32.xlu0 %v1628_v58 }
 0x742   : > { %v5067_v59 = vpop.f32.mrb[8].mxu0 }
 0x743   : > { %v3008_v60 = vpop.f32.mrb[9].mxu0  ;;  %v1760_v1 = vsel %vm1361_vm7, %v5067_v59, -inf }
 0x744   : > { %v1756_v61 = vpop.f32.mrb[10].mxu0 }
 0x745   : > { %1511 = vrot.lane.b32.xlu1 %v5029_v25, %s4096_s27  ;;  %v3009_v62 = vpop.f32.mrb[11].mxu0  ;;  %v1763_v63 = vsel %vm1365_vm8, %v1756_v61, -inf }
 0x746   : > { %1764 = vmax.xlane.f32.xlu0 %v1763_v63 }
 0x75c   : > { %1646 = vrot.lane.b32.xlu0 %v5029_v25, %s4097_s6 }
 0x769   : > { %1626 = vmax.xlane.f32.xlu1 %v1625_v0 }
 0x76d   : > { %1761 = vmax.xlane.f32.xlu1 %v1760_v1 }
 0x77e   : > { %1781 = vrot.lane.b32.xlu1 %v5029_v25, %s4099_s26 }
 0x7c1   : > { %v1364_v2 = vpop.xlane.xlu1 %1363  ;;  %v1491_v3 = vpop.xlane.xlu0 %1490 }
 0x7c2   : > { %v1369_v4 = vsub.f32 %v1354_v41, %v1364_v2  ;;  %v1495_v5 = vsub.f32 %v1482_v42, %v1491_v3 }
 0x7c4   : > { %v1497_v6 = vmul.f32 1.442695, %v1495_v5  ;;  %v1371_v9 = vmul.f32 1.442695, %v1369_v4 }
 0x7c5   : > { %v1368_v12 = vpop.xlane.xlu0 %1367  ;;  %v1512_v26 = vpop.permute.xlu1 %1511 }
 0x7c6   : > { %v1370_v13 = vsub.f32 %v1357_v48, %v1368_v12  ;;  %3321 = vpow2.f32 %v1497_v6  ;;  %v1517_v32 = vsel %vm1387_vm6, %v1512_v26, 0  ;;  %v3287_v26 = vld [vmem:[%s4936_s13 + $0x10] sm:$0xff]  }
 0x7c7   : > { %3323 = vpow2.f32 %v1371_v9 }
 0x7c8   : > { %v1373_v14 = vmul.f32 1.442695, %v1370_v13 }
 0x7c9   : > { %v1494_v15 = vpop.xlane.xlu0 %1493 }
 0x7ca   : > { %3325 = vpow2.f32 %v1373_v14  ;;  %v1496_v16 = vsub.f32 %v1485_v47, %v1494_v15 }
 0x7cc   : > { %v1499_v17 = vmul.f32 1.442695, %v1496_v16 }
 0x7cd   : > { %v1630_v18 = vpop.xlane.xlu0 %1629 }
 0x7ce   : > { %3327 = vpow2.f32 %v1499_v17  ;;  %v1632_v19 = vsub.f32 %v1621_v56, %v1630_v18 }
 0x7d0   : > { %v1635_v20 = vmul.f32 1.442695, %v1632_v19  ;;  %v3322_v21 = vpop.eup %3321 }
 0x7d1   : > { %v1501_v22 = vsel %vm1361_vm7, %v3322_v21, 0.0  ;;  %v3324_v23 = vpop.eup %3323 }
 0x7d2   : > { %3329 = vpow2.f32 %v1635_v20  ;;  %1502 = vadd.xlane.f32.xlu1 %v1501_v22  ;;  %v1375_v58 = vsel %vm1361_vm7, %v3324_v23, 0.0  ;;  %v3285_v22 = vld [vmem:[%s4936_s13] sm:$0xff]  }
 0x7d3   : > { %v1765_v24 = vpop.xlane.xlu0 %1764  ;;  %3017 = vmatpush3.bf16.msra.mxu0 %v3285_v22 }
 0x7d4   : > { %v3326_v25 = vpop.eup %3325  ;;  %v1767_v27 = vsub.f32 %v1756_v61, %v1765_v24  ;;  %3018 = vmatprep.subr.bf16.mxu0 %v4092_v10 }
 0x7d5   : > { %v1383_v28 = vpack.c.bf16 %v3326_v25, %v3324_v23  ;;  %v1378_v42 = vsel %vm1365_vm8, %v3326_v25, 0.0  ;;  %v3286_v23 = vld [vmem:[%s4936_s13 + $0x8] sm:$0xff]  }
 0x7d6   : > { %v1770_v29 = vmul.f32 1.442695, %v1767_v27 }
 0x7d7   : > { %2977 = vmatmul.mubr.msk.bf16.vlgmr.msra.gmra.mrb[8].mxu1 %vm1361_vm7, %v1383_v28  ;;  %v1647_v37 = vpop.permute.xlu0 %1646  ;;  %3019 = vmatpush3.bf16.msra.mxu0 %v3286_v23 }
 0x7d8   : > { %v3328_v33 = vpop.eup %3327  ;;  %3331 = vpow2.f32 %v1770_v29  ;;  %2987 = vmatpush3.bf16.msra.mxu1 %v1517_v32  ;;  %2988 = vmatprep.mubr.msk.bf16.mxu1 %vm4093_vm4, %v4092_v10  ;;  %v1652_v39 = vsel %vm1387_vm6, %v1647_v37, 0 }
 0x7d9   : > { %v1504_v34 = vsel %vm1365_vm8, %v3328_v33, 0.0  ;;  %2998 = vmatprep.subr.bf16.mxu1 %v4092_v10  ;;  %v1509_v35 = vpack.c.bf16 %v3328_v33, %v3322_v21  ;;  %3020 = vmatprep.subr.bf16.mxu0 %v4092_v10 }
 0x7da   : > { %1505 = vadd.xlane.f32.xlu0 %v1504_v34  ;;  %v3288_v34 = vld [vmem:[%s4936_s13 + $0x18] sm:$0xff]   ;;  %s5436_s13 = scalar_lea.vmem [#allocation18], %s4914_s5 }
 0x7db   : > { %3021 = vmatpush3.bf16.msra.mxu0 %v3287_v26 }
 0x7dc   : > { %v3330_v36 = vpop.eup %3329  ;;  %3022 = vmatprep.subr.bf16.mxu0 %v4092_v10 }
 0x7dd   : > { %v1640_v38 = vsel %vm1365_vm8, %v3330_v36, 0.0 }
 0x7de   : > { %1641 = vadd.xlane.f32.xlu1 %v1640_v38 }
 0x7df   : > { %2989 = vmatmul.mubr.msk.bf16.vlgmr.msra.gmra.mrb[12].mxu1 %vm1361_vm7, %v1509_v35  ;;  %3023 = vmatpush3.bf16.msra.mxu0 %v3288_v34 }
 0x7e0   : > { %2999 = vmatpush3.bf16.msra.mxu1 %v1652_v39  ;;  %3000 = vmatprep.mubr.msk.bf16.mxu1 %vm4093_vm4, %v4092_v10 }
 0x7e1   : > { %3010 = vmatprep.subr.bf16.mxu1 %v4092_v10 }
 0x7e2   : > { %v3332_v40 = vpop.eup %3331 }
 0x7e3   : > { %v1775_v41 = vsel %vm1365_vm8, %v3332_v40, 0.0 }
 0x7e4   : > { %1776 = vadd.xlane.f32.xlu1 %v1775_v41 }
 0x7e8   : > { %1379 = vadd.xlane.f32.xlu1 %v1378_v42 }
 0x7f6   : > { %v1627_v43 = vpop.xlane.xlu1 %1626 }
 0x7f7   : > { %v1631_v44 = vsub.f32 %v5063_v53, %v1627_v43 }
 0x7f9   : > { %v1633_v45 = vmul.f32 1.442695, %v1631_v44 }
 0x7fa   : > { %v1762_v46 = vpop.xlane.xlu1 %1761 }
 0x7fb   : > { %3333 = vpow2.f32 %v1633_v45  ;;  %v1766_v47 = vsub.f32 %v5067_v59, %v1762_v46 }
 0x7fd   : > { %v1768_v48 = vmul.f32 1.442695, %v1766_v47 }
 0x7fe   : > { %v1782_v50 = vpop.permute.xlu1 %1781 }
 0x7ff   : > { %3335 = vpow2.f32 %v1768_v48  ;;  %v1787_v55 = vsel %vm1387_vm6, %v1782_v50, 0 }
 0x805   : > { %v3334_v49 = vpop.eup %3333 }
 0x806   : > { %v1637_v51 = vsel %vm1361_vm7, %v3334_v49, 0.0  ;;  %v1645_v54 = vpack.c.bf16 %v3330_v36, %v3334_v49 }
 0x807   : > { %1638 = vadd.xlane.f32.xlu0 %v1637_v51 }
 0x808   : > { %3001 = vmatmul.mubr.msk.bf16.vlgmr.msra.gmra.mrb[16].mxu1 %vm1361_vm7, %v1645_v54  ;;  %v2863_v54 = vld [vmem:[%s5436_s13] ss:$0 sm:$0xff] }
 0x809   : > { %v3336_v56 = vpop.eup %3335  ;;  %3011 = vmatpush3.bf16.msra.mxu1 %v1787_v55  ;;  %3012 = vmatprep.mubr.msk.bf16.mxu1 %vm4093_vm4, %v4092_v10 }
 0x80a   : > { %v1772_v53 = vsel %vm1361_vm7, %v3336_v56, 0.0  ;;  %v1780_v57 = vpack.c.bf16 %v3332_v40, %v3336_v56 }
 0x80b   : > { %1773 = vadd.xlane.f32.xlu0 %v1772_v53 }
 0x80f   : > { %1376 = vadd.xlane.f32.xlu0 %v1375_v58 }
 0x810   : > { %3013 = vmatmul.mubr.msk.bf16.vlgmr.msra.gmra.mrb[20].mxu1 %vm1361_vm7, %v1780_v57 }
 0x811   : > { %2072 = vmatprep.mubr.bf16.mxu1 %v4091_v52 }
 0x85f   : > { %v1503_v60 = vpop.xlane.xlu1 %1502 }
 0x867   : > { %v1506_v59 = vpop.xlane.xlu0 %1505 }
 0x86b   : > { %v1642_v62 = vpop.xlane.xlu1 %1641 }
 0x871   : > { %v1777_v0 = vpop.xlane.xlu1 %1776 }
 0x875   : > { %v1380_v2 = vpop.xlane.xlu1 %1379 }
 0x894   : > { %v1639_v61 = vpop.xlane.xlu0 %1638 }
 0x898   : > { %v1774_v63 = vpop.xlane.xlu0 %1773 }
 0x89c   : > { %v1377_v1 = vpop.xlane.xlu0 %1376 }
 0x89d   : > { %3337 = vrcp.f32 %v1377_v1 }
 0x89e   : > { %3339 = vrcp.f32 %v1380_v2 }
 0x89f   : > { %3341 = vrcp.f32 %v1503_v60 }
 0x8a0   : > { %3343 = vrcp.f32 %v1506_v59 }
 0x8a1   : > { %3345 = vrcp.f32 %v1639_v61 }
 0x8a2   : > { %3347 = vrcp.f32 %v1642_v62 }
 0x8a3   : > { %3349 = vrcp.f32 %v1774_v63 }
 0x8a4   : > { %3351 = vrcp.f32 %v1777_v0 }
 0x8a7   : > { %v3338_v3 = vpop.eup %3337 }
 0x8a8   : > { %v3340_v9 = vpop.eup %3339 }
 0x8a9   : > { %v3342_v14 = vpop.eup %3341 }
 0x8aa   : > { %v1425_v4 = vpop.f32.mrb[8].mxu1  ;;  %v3344_v18 = vpop.eup %3343 }
 0x8ab   : > { %v1432_v5 = vmul.f32 %v3338_v3, %v1425_v4  ;;  %v2978_v6 = vpop.f32.mrb[9].mxu1  ;;  %v3346_v24 = vpop.eup %3345 }
 0x8ac   : > { %v1428_v12 = vpop.f32.mrb[10].mxu1  ;;  %v3348_v33 = vpop.eup %3347 }
 0x8ad   : > { %1434 = vst.msk [vmem:[#allocation3] sm:$0xff] %vm1313_vm5, %v1432_v5  ;;  %v1433_v52 = vmul.f32 %v3340_v9, %v1428_v12  ;;  %v2979_v13 = vpop.f32.mrb[11].mxu1  ;;  %v3350_v36 = vpop.eup %3349  ;;  %v3291_v12 = vld [vmem:[%s4951_s8 + $0x4] ss:$8 sps:$4 sm:$0xff]  }
 0x8ae   : > { %v3352_v40 = vpop.eup %3351  ;;  %2040 = vmatprep.subr.bf16.mxu1 %v3291_v12  ;;  %v3294_v13 = vld [vmem:[%s4951_s8 + $0x14] ss:$8 sps:$4 sm:$0xff]  }
 0x8af   : > { %1436 = vst.msk [vmem:[#allocation3 + $0x8] sm:$0xf] %vm1435_vm9, %v1433_v52  ;;  %v3289_v52 = vld [vmem:[%s4951_s8] ss:$8 sps:$4 sm:$0xff]  }
 0x8b0   : > { %2041 = vmatpush1.bf16.msra.mxu1 %v3289_v52 }
 0x8b1   : > { %2042 = vmatprep.subr.bf16.mxu1 %v3294_v13 }
 0x8b2   : > { %v1553_v15 = vpop.f32.mrb[12].mxu1 }
 0x8b3   : > { %v1560_v16 = vmul.f32 %v3342_v14, %v1553_v15  ;;  %v2990_v17 = vpop.f32.mrb[13].mxu1  ;;  %v3292_v14 = vld [vmem:[%s4951_s8 + $0x10] ss:$8 sps:$4 sm:$0xff]   ;;  %v3297_v15 = vld [vmem:[%s4951_s8 + $0x24] ss:$8 sps:$4 sm:$0xff]  }
 0x8b4   : > { %v1556_v19 = vpop.f32.mrb[14].mxu1  ;;  %2043 = vmatpush1.bf16.msra.mxu1 %v3292_v14  ;;  %v3298_v17 = vld [vmem:[%s4951_s8 + $0x30] ss:$8 sps:$4 sm:$0xff]  }
 0x8b5   : > { %v1561_v20 = vmul.f32 %v3344_v18, %v1556_v19  ;;  %v2991_v21 = vpop.f32.mrb[15].mxu1  ;;  %1564 = vrot.lane.b32.xlu0 %v1560_v16, %s4100_s23  ;;  %v3295_v16 = vld [vmem:[%s4951_s8 + $0x20] ss:$8 sps:$4 sm:$0xff]   ;;  %2044 = vmatprep.subr.bf16.mxu1 %v3297_v15  ;;  %v3300_v18 = vld [vmem:[%s4951_s8 + $0x34] ss:$8 sps:$4 sm:$0xff]   ;;  %s5438_s8 = sld [smem:[#allocation49_spill]] }
 0x8b7   : > { %1566 = vrot.lane.b32.xlu1 %v1561_v20, %s4100_s23 }
 0x8b8   : > { %2045 = vmatpush1.bf16.msra.mxu1 %v3295_v16 }
 0x8b9   : > { %2046 = vmatprep.subr.bf16.mxu1 %v3300_v18 }
 0x8bb   : > { %p2901_p11 = scmp.ne.s32.totalorder %s5438_s8, 1 }
 0x8bc   : > { %2047 = vmatpush1.bf16.msra.mxu1 %v3298_v17  ;;  %vm4102_vm0 = vmmov (!%p2901_p11), 0   ;;  %vm2406_vm1 = vcmask (!%p2901_p11), 257024  }
 0x8db   : > { %v1688_v25 = vpop.f32.mrb[16].mxu1 }
 0x8dc   : > { %v1695_v27 = vmul.f32 %v3346_v24, %v1688_v25  ;;  %v3002_v28 = vpop.f32.mrb[17].mxu1 }
 0x8dd   : > { %v1691_v29 = vpop.f32.mrb[18].mxu1 }
 0x8de   : > { %v3003_v32 = vpop.f32.mrb[19].mxu1  ;;  %1699 = vrot.lane.b32.xlu1 %v1695_v27, %s4098_s4  ;;  %v1696_v35 = vmul.f32 %v3348_v33, %v1691_v29  ;;  %v2869_v27 = vld [vmem:[%s5437_s1] ss:$0 sm:$0xff] }
 0x8df   : > { %v2870_v33 = vld [vmem:[%s939_s12] ss:$0 sm:$0xff] }
 0x8e2   : > { %1701 = vrot.lane.b32.xlu1 %v1696_v35, %s4098_s4 }
 0x8e3   : > { %v1823_v37 = vpop.f32.mrb[20].mxu1 }
 0x8e4   : > { %v1830_v38 = vmul.f32 %v3350_v36, %v1823_v37  ;;  %v3014_v39 = vpop.f32.mrb[21].mxu1 }
 0x8e5   : > { %v1826_v41 = vpop.f32.mrb[22].mxu1  ;;  %v3302_v39 = vld [vmem:[%s4961_s3] sm:$0xff]  }
 0x8e6   : > { %v1831_v42 = vmul.f32 %v3352_v40, %v1826_v41  ;;  %v3015_v43 = vpop.f32.mrb[23].mxu1  ;;  %1834 = vrot.lane.b32.xlu0 %v1830_v38, %s4094_s10  ;;  %v3301_v38 = vld [vmem:[%s4961_s3 + $0x40] sm:$0xff]   ;;  %v3303_v40 = vld [vmem:[%s4961_s3 + $0x48] sm:$0xff]  }
 0x8e7   : > { %2941 = vmatprep.subr.bf16.mxu0 %v3301_v38  ;;  %v3304_v41 = vld [vmem:[%s4961_s3 + $0x8] sm:$0xff]   ;;  %v3306_v43 = vld [vmem:[%s4961_s3 + $0x10] sm:$0xff]  }
 0x8e8   : > { %1836 = vrot.lane.b32.xlu1 %v1831_v42, %s4094_s10  ;;  %v3305_v42 = vld [vmem:[%s4961_s3 + $0x50] sm:$0xff]  }
 0x927   : > { %v1565_v44 = vpop.permute.xlu0 %1564 }
 0x928   : > { %1571 = vst.msk [vmem:[#allocation3] sm:$0xff] %vm1570_vm10, %v1565_v44  ;;  %v3307_v44 = vld [vmem:[%s4961_s3 + $0x58] sm:$0xff]  }
 0x929   : > { %v1567_v10 = vpop.permute.xlu1 %1566 }
 0x92a   : > { %1573 = vst.msk [vmem:[#allocation3 + $0x8] sm:$0xf] %vm1572_vm11, %v1567_v10  ;;  %v3308_v10 = vld [vmem:[%s4961_s3 + $0x18] sm:$0xff]  }
 0x950   : > { %v1700_v45 = vpop.permute.xlu1 %1699 }
 0x951   : > { %1706 = vst.msk [vmem:[#allocation3] sm:$0xff] %vm1705_vm12, %v1700_v45  ;;  %v3309_v45 = vld [vmem:[%s4961_s3 + $0x60] sm:$0xff]  }
 0x954   : > { %v1702_v46 = vpop.permute.xlu1 %1701 }
 0x955   : > { %1708 = vst.msk [vmem:[#allocation3 + $0x8] sm:$0xf] %vm1707_vm13, %v1702_v46  ;;  %v3310_v46 = vld [vmem:[%s4961_s3 + $0x20] sm:$0xff]  }
 0x958   : > { %v1835_v47 = vpop.permute.xlu0 %1834 }
 0x959   : > { %1841 = vst.msk [vmem:[#allocation3] sm:$0xff] %vm1840_vm14, %v1835_v47  ;;  %v3311_v47 = vld [vmem:[%s4961_s3 + $0x68] sm:$0xff]  }
 0x95a   : > { %v1837_v48 = vpop.permute.xlu1 %1836 }
 0x95b   : > { %1843 = vst.msk [vmem:[#allocation3 + $0x8] sm:$0xf] %vm1842_vm15, %v1837_v48  ;;  %v3312_v48 = vld [vmem:[%s4961_s3 + $0x28] sm:$0xff]  }
 0x960   : > { %v1844_v49 = vld [vmem:[#allocation3] sm:$0xff] }
 0x962   : > { %v1845_v50 = vld [vmem:[#allocation3 + $0x8] sm:$0xf] }
 0x963   : > { %v1846_v51 = vpack.c.bf16 %v1845_v50, %v1844_v49  ;;  %v3313_v49 = vld [vmem:[%s4961_s3 + $0x70] sm:$0xff]  }
 0x964   : > { %v3314_v50 = vld [vmem:[%s4961_s3 + $0x30] sm:$0xff]  }
 0x965   : > { %3025 = vmatmul.mubr.msk.bf16.vlgmr.msra.gmra.mrb[12].mxu0 %vm1153_vm2, %v1846_v51  ;;  %v3315_v51 = vld [vmem:[%s4961_s3 + $0x78] sm:$0xff]  }
 0x966   : > { %2942 = vmatpush3.bf16.msra.mxu0 %v3302_v39 }
 0x967   : > { %2943 = vmatprep.subr.bf16.mxu0 %v3303_v40 }
 0x96a   : > { %2944 = vmatpush3.bf16.msra.mxu0 %v3304_v41 }
 0x96b   : > { %2945 = vmatprep.subr.bf16.mxu0 %v3305_v42 }
 0x96e   : > { %2946 = vmatpush3.bf16.msra.mxu0 %v3306_v43 }
 0x96f   : > { %2947 = vmatprep.subr.bf16.mxu0 %v3307_v44 }
 0x972   : > { %2948 = vmatpush3.bf16.msra.mxu0 %v3308_v10 }
 0x973   : > { %2949 = vmatprep.subr.bf16.mxu0 %v3309_v45  ;;  %v4101_v45 = vmov (!%p2901_p11), 0.0  }
 0x976   : > { %2950 = vmatpush3.bf16.msra.mxu0 %v3310_v46  ;;  %v3375_v46 = vld [vmem:[#allocation31 + $0x10] sm:$0xff] (!%p2901_p11)  }
 0x977   : > { %2951 = vmatprep.subr.bf16.mxu0 %v3311_v47  ;;  %v3376_v47 = vld [vmem:[#allocation31 + $0x18] sm:$0xff] (!%p2901_p11)  }
 0x97a   : > { %2952 = vmatpush3.bf16.msra.mxu0 %v3312_v48 }
 0x97b   : > { %2953 = vmatprep.subr.bf16.mxu0 %v3313_v49 }
 0x97e   : > { %2954 = vmatpush3.bf16.msra.mxu0 %v3314_v50 }
 0x97f   : > { %2955 = vmatprep.subr.bf16.mxu0 %v3315_v51 }
 0xa38   : > { %v1923_v55 = vpop.f32.mrb[12].mxu0 }
 0xa39   : > { %v1924_v56 = vadd.f32 %v2863_v54, %v1923_v55  ;;  %v3026_v53 = vpop.f32.mrb[13].mxu0  ;;  %v1985_v55 = vld [vmem:[%s4958_s28] sm:$0x3] }
 0xa3a   : > { %v1926_v57 = vpop.f32.mrb[14].mxu0  ;;  %v1994_v53 = vrot.slane %v1985_v55, %v1215_v11 }
 0xa3b   : > { %v5124_v58 = vadd.f32 %v1924_v56, %v4988_v30  ;;  %v1927_v59 = vadd.f32 %v2863_v54, %v1926_v57  ;;  %v3027_v60 = vpop.f32.mrb[15].mxu0  ;;  %v3316_v54 = vld [vmem:[%s4961_s3 + $0x38] sm:$0xff]   ;;  %v1990_v56 = vrot.slane %v1985_v55, %v1211_v8 }
 0xa3c   : > { %2956 = vmatpush3.bf16.msra.mxu0 %v3316_v54  ;;  %v2902_v54 = vld [vmem:[#allocation28] ss:$0 sm:$0xff] (!%p2901_p11) }
 0xa3d   : > { %v5127_v61 = vadd.f32 %v1927_v59, %v4990_v31  ;;  %v1934_v62 = vsel %vm1153_vm2, %v5124_v58, 0.0  ;;  %3028 = vmatprep.subr.bf16.mxu0 (!%p2901_p11), %v4101_v45 }
 0xa3e   : > { %1935 = vadd.xlane.f32.xlu0 %v1934_v62 }
 0xa3f   : > { %v1937_v63 = vsel %vm1157_vm3, %v5127_v61, 0.0 }
 0xa40   : > { %1938 = vadd.xlane.f32.xlu1 %v1937_v63 }
 0xacb   : > { %v1936_v0 = vpop.xlane.xlu0 %1935 }
 0xacc   : > { %v1940_v1 = vmul.f32 0.015625, %v1936_v0 }
 0xacd   : > { %v1939_v30 = vpop.xlane.xlu1 %1938 }
 0xace   : > { %v1942_v2 = vsub.f32 %v5124_v58, %v1940_v1  ;;  %v1941_v3 = vmul.f32 0.015625, %v1939_v30 }
 0xad0   : > { %v1943_v31 = vsub.f32 %v5127_v61, %v1941_v3  ;;  %v1944_v4 = vmul.f32 %v1942_v2, %v1942_v2 }
 0xad2   : > { %v1946_v5 = vsel %vm1153_vm2, %v1944_v4, 0.0  ;;  %v1945_v6 = vmul.f32 %v1943_v31, %v1943_v31 }
 0xad3   : > { %1947 = vadd.xlane.f32.xlu0 %v1946_v5 }
 0xad4   : > { %v1949_v9 = vsel %vm1157_vm3, %v1945_v6, 0.0 }
 0xad7   : > { %1950 = vadd.xlane.f32.xlu0 %v1949_v9 }
 0xb60   : > { %v1948_v19 = vpop.xlane.xlu0 %1947 }
 0xb61   : > { %v1952_v20 = vmul.f32 0.015625, %v1948_v19 }
 0xb63   : > { %v1954_v21 = vadd.f32 1e-05, %v1952_v20 }
 0xb64   : > { %v1951_v22 = vpop.xlane.xlu0 %1950 }
 0xb65   : > { %3353 = vrsqrt.f32 %v1954_v21  ;;  %v1953_v23 = vmul.f32 0.015625, %v1951_v22 }
 0xb67   : > { %v1955_v24 = vadd.f32 1e-05, %v1953_v23 }
 0xb69   : > { %3355 = vrsqrt.f32 %v1955_v24 }
 0xb6f   : > { %v3354_v25 = vpop.eup %3353 }
 0xb70   : > { %v1958_v26 = vmul.f32 %v3354_v25, %v1942_v2 }
 0xb72   : > { %v1966_v29 = vmul.f32 %v2869_v27, %v1958_v26 }
 0xb73   : > { %v3356_v28 = vpop.eup %3355 }
 0xb74   : > { %v1959_v32 = vmul.f32 %v3356_v28, %v1943_v31  ;;  %v1974_v35 = vadd.f32 %v2870_v33, %v1966_v29  ;;  %v2884_v28 = vld [vmem:[%s974_s11] ss:$0 sm:$0xff] }
 0xb76   : > { %v1967_v34 = vmul.f32 %v2869_v27, %v1959_v32 }
 0xb78   : > { %v1975_v36 = vadd.f32 %v2870_v33, %v1967_v34 }
 0xb7a   : > { %v1976_v37 = vpack.c.bf16 %v1975_v36, %v1974_v35 }
 0xb7c   : > { %2879 = vmatmul.mubr.msk.bf16.vlgmr.msra.gmra.mrb[24].mxu1 %vm1153_vm2, %v1976_v37 }
 0xc4f   : > { %v2074_v57 = vpop.f32.mrb[24].mxu1 }
 0xc50   : > { %v2075_v59 = vadd.f32 %v2074_v57, %v1990_v56  ;;  %v2076_v60 = vpop.f32.mrb[25].mxu1 }
 0xc51   : > { %v2077_v62 = vadd.f32 %v2076_v60, %v1994_v53  ;;  %v2078_v63 = vpop.f32.mrb[26].mxu1 }
 0xc52   : > { %v2880_v0 = vmul.f32 -1.702, %v2075_v59  ;;  %v2079_v1 = vadd.f32 %v2078_v63, %v1990_v56  ;;  %v2080_v30 = vpop.f32.mrb[27].mxu1  ;;  %v2903_v56 = vld [vmem:[#allocation30] ss:$0 sm:$0xff] (!%p2901_p11) }
 0xc53   : > { %v2881_v2 = vmul.f32 -1.702, %v2077_v62  ;;  %v2081_v3 = vadd.f32 %v2080_v30, %v1994_v53 }
 0xc54   : > { %v2091_v31 = vmul.f32 1.442695, %v2880_v0  ;;  %v2882_v4 = vmul.f32 -1.702, %v2079_v1 }
 0xc55   : > { %v2093_v5 = vmul.f32 1.442695, %v2881_v2  ;;  %v2883_v6 = vmul.f32 -1.702, %v2081_v3 }
 0xc56   : > { %3357 = vpow2.f32 %v2091_v31  ;;  %v2095_v9 = vmul.f32 1.442695, %v2882_v4 }
 0xc57   : > { %3359 = vpow2.f32 %v2093_v5  ;;  %v2097_v8 = vmul.f32 1.442695, %v2883_v6 }
 0xc58   : > { %3361 = vpow2.f32 %v2095_v9 }
 0xc59   : > { %3363 = vpow2.f32 %v2097_v8 }
 0xc60   : > { %v3358_v7 = vpop.eup %3357 }
 0xc61   : > { %v3360_v11 = vpop.eup %3359  ;;  %v2099_v12 = vadd.f32 1.0, %v3358_v7 }
 0xc62   : > { %v3362_v52 = vpop.eup %3361  ;;  %v2100_v13 = vadd.f32 1.0, %v3360_v11 }
 0xc63   : > { %v3364_v14 = vpop.eup %3363  ;;  %3365 = vrcp.f32 %v2099_v12  ;;  %v2101_v15 = vadd.f32 1.0, %v3362_v52 }
 0xc64   : > { %3367 = vrcp.f32 %v2100_v13  ;;  %v2102_v16 = vadd.f32 1.0, %v3364_v14 }
 0xc65   : > { %3369 = vrcp.f32 %v2101_v15 }
 0xc66   : > { %3371 = vrcp.f32 %v2102_v16 }
 0xc6d   : > { %v3366_v17 = vpop.eup %3365 }
 0xc6e   : > { %v3368_v18 = vpop.eup %3367  ;;  %v2111_v21 = vmul.f32 %v3366_v17, %v2075_v59 }
 0xc6f   : > { %v3370_v19 = vpop.eup %3369  ;;  %v2112_v23 = vmul.f32 %v3368_v18, %v2077_v62 }
 0xc70   : > { %v3372_v20 = vpop.eup %3371  ;;  %v2113_v22 = vmul.f32 %v3370_v19, %v2079_v1 }
 0xc71   : > { %v2114_v24 = vmul.f32 %v3372_v20, %v2081_v3 }
 0xc72   : > { %v2115_v25 = vpack.c.bf16 %v2113_v22, %v2111_v21 }
 0xc73   : > { %v2116_v26 = vpack.c.bf16 %v2114_v24, %v2112_v23 }
 0xc75   : > { %2284 = vmatprep.mubr.bf16.mxu0 %v2116_v26 }
 0xc76   : > { %2285 = vmatmul.mubr.bf16.vlgmr.msra.gmra.mrb[16].mxu0 %v2115_v25 }
 0xc77   : > { %3036 = vmatprep.mubr.msk.bf16.mxu0 (!%p2901_p11), %vm4102_vm0, %v4101_v45 }
 0xd49   : > { %v2957_v27 = vpop.f32.mrb[16].mxu0 }
 0xd4a   : > { %v2958_v29 = vpop.f32.mrb[17].mxu0 }
 0xd4b   : > { %v2959_v32 = vadd.f32 %v2958_v29, %v2957_v27  ;;  %v2960_v33 = vpop.f32.mrb[18].mxu0 }
 0xd4c   : > { %v2961_v34 = vpop.f32.mrb[19].mxu0 }
 0xd4d   : > { %v2287_v35 = vadd.f32 %v2959_v32, %v2884_v28  ;;  %v2962_v36 = vadd.f32 %v2961_v34, %v2960_v33  ;;  %2300 = sbr.rel (%p2901_p11) target bundleno = 3941 (0xf65), region = 172 }
 0xd4f   : > { %v2293_v37 = vadd.f32 %v2287_v35, %v5124_v58  ;;  %v2290_v38 = vadd.f32 %v2962_v36, %v2884_v28  ;;  %v3373_v58 = vld [vmem:[#allocation31] sm:$0xff] (!%p2901_p11)  }
 0xd50   : > { %3029 = vmatpush3.bf16.msra.mxu0 (!%p2901_p11), %v3373_v58 }
 0xd51   : > { %2295 = vst.msk [vmem:[#allocation2] sm:$0xff] %vm1153_vm2, %v2293_v37  ;;  %v2294_v39 = vadd.f32 %v2290_v38, %v5127_v61  ;;  %v3374_v61 = vld [vmem:[#allocation31 + $0x8] sm:$0xff] (!%p2901_p11)   ;;  %3030 = vmatprep.subr.bf16.mxu0 (!%p2901_p11), %v4101_v45 }
 0xd53   : > { %2296 = vst.msk [vmem:[#allocation2 + $0x8] sm:$0xf] %vm1157_vm3, %v2294_v39  ;;  %v2303_v40 = vsel (!%p2901_p11), %vm1157_vm3, %v2294_v39, 0.0 }
 0xd54   : > { %2304 = vadd.xlane.f32.xlu0 %v2303_v40  ;;  %3031 = vmatpush3.bf16.msra.mxu0 %v3374_v61 }
 0xd55   : > { %3032 = vmatprep.subr.bf16.mxu0 %v4101_v45 }
 0xd58   : > { %3033 = vmatpush3.bf16.msra.mxu0 %v3375_v46 }
 0xd59   : > { %3034 = vmatprep.subr.bf16.mxu0 %v4101_v45 }
 0xd5c   : > { %3035 = vmatpush3.bf16.msra.mxu0 %v3376_v47 }
 0xde1   : > { %v2305_v41 = vpop.xlane.xlu0 %2304 }
 0xde2   : > { %v2306_v42 = vmul.f32 0.015625, %v2305_v41 }
 0xde4   : > { %v2307_v43 = vsub.f32 %v2294_v39, %v2306_v42 }
 0xde6   : > { %v2308_v44 = vmul.f32 %v2307_v43, %v2307_v43 }
 0xde8   : > { %v2309_v10 = vsel %vm1157_vm3, %v2308_v44, 0.0 }
 0xde9   : > { %2310 = vadd.xlane.f32.xlu0 %v2309_v10 }
 0xe76   : > { %v2311_v48 = vpop.xlane.xlu0 %2310 }
 0xe77   : > { %v2312_v49 = vmul.f32 0.015625, %v2311_v48 }
 0xe79   : > { %v2313_v50 = vadd.f32 1e-05, %v2312_v49 }
 0xe7b   : > { %3377 = vrsqrt.f32 %v2313_v50 }
 0xe85   : > { %v3378_v51 = vpop.eup %3377 }
 0xe86   : > { %v2315_v55 = vmul.f32 %v3378_v51, %v2307_v43 }
 0xe88   : > { %v2322_v53 = vmul.f32 %v2902_v54, %v2315_v55 }
 0xe8a   : > { %v2329_v57 = vadd.f32 %v2903_v56, %v2322_v53 }
 0xe8c   : > { %v2330_v59 = vpack.c.bf16 %v2329_v57, %v2329_v57 }
 0xe8e   : > { %3037 = vmatmul.mubr.msk.bf16.vlgmr.msra.gmra.mrb[0].mxu0 %vm1153_vm2, %v2330_v59 }
 0xf61   : > { %v2400_v60 = vpop.f32.mrb[0].mxu0 }
 0xf62   : > { %2407 = vst.msk [vmem:[%s4977_s14] sm:$0xf] %vm2406_vm1, %v2400_v60  ;;  %v3038_v62 = vpop.f32.mrb[1].mxu0 }
 0xf63   : > { %v2403_v63 = vpop.f32.mrb[2].mxu0 }
 0xf64   : > { %v3039_v0 = vpop.f32.mrb[3].mxu0 }
 0xf65 PF: > { %s5439_s5 = sld [smem:[#allocation50_spill]]  ;;  %s5440_s11 = sld [smem:[#allocation74_spill]] }
 0xf66   : > { %s2422_s10 = sshll.u32 %s4977_s14, 4  ;;  %s2409_s29 = scalar_lea.sflag [#allocation6], %s4896_s9  ;;  %s2423_s10 = int_to_ptr.vmem [resolvable:$true] %s2422_s10 }
 0xf67   : > { %s3909_s27 = scalar_lea.vmem %s2423_s10, 64  ;;  %p5441_p6 = scmp.ne.s32.totalorder %s5390_s15, 0 }
 0xf68   : > { %p3910_p2 = scmp.ne.s32.totalorder %s2423_s10, %s3909_s27  ;;  %s4103_s6 = smov [#allocation33]  }
 0xf69   : > { %s3913_s4 = sshll.u32 %s4103_s6, 4  ;;  %s3914_s4 = int_to_ptr.vmem [resolvable:$false] %s3913_s4 }
 0xf6a   : > { %p3911_p7 = pnand %p3910_p2, %p5441_p6  ;;  %s3915_s26 = scalar_lea.vmem %s3914_s4, 128 }
 0xf6b   : > { %s2910_s28 = sshll.u32 %s5439_s5, 6  ;;  %p3916_p10 = scmp.lt.s32.totalorder %s2423_s10, %s3914_s4 }
 0xf6c   : > { %s5186_s24 = scalar_lea.hbm %s5440_s11, %s2910_s28  ;;  %p3912_p0 = pneg %p3911_p7 }
 0xf6d   : > { %p3917_p13 = scmp.lt.s32.totalorder %s3915_s26, %s3909_s27 }
 0xf6f   : > { %p3918_p3 = por %p3917_p13, %p3916_p10 }
 0xf71   : > { %p3919_p5 = pnand %p3918_p3, %p3912_p0 }
 0xf73   : > { %3922 = shalt.err (!%p3919_p5)
}
 0xf74   : > { %s3923_s9 = scalar_lea.hbm %s5186_s24, 64  ;;  %s3927_s13 = scalar_lea.hbm %s5440_s11, 128 }
 0xf75   : > { %p3924_p1 = scmp.ne.s32.totalorder %s5186_s24, %s3923_s9  ;;  %p3928_p4 = scmp.lt.u32.totalorder %s5186_s24, %s5440_s11 }
 0xf76   : > { %p3929_p8 = scmp.lt.u32.totalorder %s3927_s13, %s3923_s9  ;;  %p3931_p2 = scmp.lt.u32.totalorder %s3923_s9, %s5186_s24 }
 0xf77   : > { %p3925_p9 = pnand %p3924_p1, %p5441_p6 }
 0xf78   : > { %p3930_p11 = por %p3929_p8, %p3928_p4 }
 0xf79   : > { %p3926_p12 = pneg %p3925_p9 }
 0xf7a   : > { %p3932_p7 = por %p3931_p2, %p3930_p11 }
 0xf7c   : > { %p3933_p0 = pnand %p3932_p7, %p3926_p12 }
 0xf7e   : > { %3936 = shalt.err (!%p3933_p0)
}
 0xf7f   : > { %3086 = dma.vmem_to_hbm [thread:$0]  (%p5441_p6), %s2423_s10, 64, %s5186_s24, %s2409_s29  }
 0xf80 PF: > { %s5442_s5 = sld [smem:[#allocation47_spill]]  ;;  %p3159_p10 = scmp.ge.s32.totalorder %s4067_s2, 2 }
 0xf81   : > { %p5443_p13 = scmp.ne.s32.totalorder %s5391_s0, 0 }
 0xf83   : > { %p3145_p3 = pnand %p3159_p10, %p5443_p13 }
 0xf86   : > { %s2434_s28 = sand.u32 1, %s5442_s5  }
 0xf87   : > { %s2435_s12 = scalar_lea.sflag [#allocation6], %s2434_s28 }
 0xf88   : > { %4022 = dma.done.wait (!%p3145_p3), %s2435_s12, 64  }
 0xf89   : > { %4024 = vsyncadd (!%p3145_p3), %s2435_s12, 4294967232  ;;  %s55_s2 = sadd.s32 1, %s4067_s2   ;;  %s5444_s27 = sld [smem:[#allocation45_spill]] }
 0xf8a   : > { %p52_p5 = scmp.ge.s32.totalorder %s55_s2, 6   ;;  %s5445_s28 = sld [smem:[#allocation46_spill]] }
 0xf8b   : > { %s5446_s15 = sld [smem:[#allocation48_spill]]  ;;  %s5447_s3 = sld [smem:[#allocation55_spill]] }
 0xf8c   : > { %s5448_s29 = smov %s5463_s30  ;;  %s5450_s0 = smov %s4047_s19 }
 0xf8d   : > { %s5451_s19 = smov %s4671_s20  ;;  %s5452_s1 = smov %s4059_s21 }
 0xf8e   : > { %s5453_s20 = smov %s4063_s22  ;;  %s5454_s21 = smov %s5457_s7 }
 0xf8f   :  { %54 = sbr.rel (!%p52_p5) target bundleno = 44 (0x2c), region = 309 }
 0xf91   : > { %s5449_s30 = smov %s5446_s15  ;;  %s5455_s22 = smov %s5447_s3 }
 0xf96   :  { %2440 = vsyncpa [#allocation5], 1 }
 0xf97   :  { %2442 = vsyncpa [#allocation5 + $0x1], 1 }
 0xf98   :  { %2443 = vsyncpa [#allocation8], 1 }
 0xf99   :  { %2444 = vsyncpa [#allocation11], 1 }
 0xf9a   :  { %2446 = vsyncpa [#allocation11 + $0x1], 1 }
 0xf9b   :  { %2447 = vsyncpa [#allocation14], 1 }
 0xf9c   :  { %2449 = vsyncpa [#allocation14 + $0x1], 1 }
 0xf9d   :  { %2450 = vsyncpa [#allocation17], 1 }
 0xf9e   :  { %2452 = vsyncpa [#allocation17 + $0x1], 1 }
 0xf9f   :  { %2453 = vsyncpa [#allocation20], 1 }
 0xfa0   :  { %2455 = vsyncpa [#allocation20 + $0x1], 1 }
 0xfa1   :  { %2456 = vsyncpa [#allocation23], 1 }
 0xfa2   :  { %2458 = vsyncpa [#allocation23 + $0x1], 1 }
 0xfa3   :  { %2459 = vsyncpa [#allocation26], 1 }
 0xfa4   :  { %2461 = vsyncpa [#allocation26 + $0x1], 1 }
 0xfa5   :  { %2462 = vsyncpa [#allocation29], 1 }
 0xfa6   :  { %2463 = vsyncpa [#allocation32], 1 }
 0xfa7   :  { %2464 = vsyncpa [#allocation6], 1 }
 0xfa8   :  { %2466 = vsyncpa [#allocation6 + $0x1], 1 }

</bundles_post_ra>
